<compile_context>
chip_gen: v7x
topology: tpu7x:2x2x1
jax: 0.10.0
libtpu: 0.0.40
codegen_flags: <defaults>
</compile_context>

<pallas_src>
import functools

import jax
import jax.numpy as jnp
from jax import lax
from jax.experimental import pallas as pl
from jax.experimental.pallas import tpu as pltpu


def _round_up(x, m):
    return ((x + m - 1) // m) * m


def _cdiv(a, b):
    return (a + b - 1) // b


def _pad_to(x, shape):
    pads = [(0, s - d) for d, s in zip(x.shape, shape)]
    return jnp.pad(x, pads)


def _attention_kernel(a_ref, enc_ref, va_ref, ctx_ref, scores_ref, energy_ref,
                      *, t_actual, t_enc_pad, t_tile, l_sub, compute_dtype):
    """One grid step == (one batch element, one L-tile of query steps).

    a_ref      : (1, L_TILE, E_pad)     hidden @ Wa, precomputed in the wrapper
    enc_ref    : (1, T_enc_pad, E_pad)  frame speaker embeddings (T_enc_pad = rup(T,8))
    va_ref     : (1, 1, E_pad)          per-batch va row
    ctx_ref    : (1, L_TILE, E_pad)     expectations_of_sampling
    scores_ref : (1, L_TILE, T_pad)     attention weights (T_pad = rup(T,128))
    energy_ref : (L_TILE, T_pad)        f32 VMEM scratch for attention energies
    """
    l_tile = a_ref.shape[1]
    t_pad = scores_ref.shape[2]
    num_l_sub = l_tile // l_sub

    va_f32 = va_ref[0].astype(jnp.float32)                 # (1, E_pad)

    # ---- Phase 1: energies[l, t] = sum_e tanh(a[l, e] + enc[t, e]) * va[e].
    # T is tiled (t_tile lanes) and L is sub-tiled (l_sub rows, fori_loop), so
    # the live tanh temp is only (l_sub, t_tile, E_pad) -- ~2 MiB at E=512.
    def t_chunk_body(t0, t_chunk):
        enc_chunk = enc_ref[0, pl.ds(t0, t_chunk), :].astype(compute_dtype)

        def l_body(j, carry):
            l0 = pl.multiple_of(j * l_sub, l_sub)
            a_sub = a_ref[0, pl.ds(l0, l_sub), :].astype(compute_dtype)
            out = jnp.tanh(a_sub[:, None, :] + enc_chunk[None, :, :])
            # E-axis contraction, accumulated in f32.
            e_sub = jnp.sum(out.astype(jnp.float32) * va_f32[None, :, :],
                            axis=-1)                       # (l_sub, t_chunk)
            energy_ref[pl.ds(l0, l_sub), pl.ds(t0, t_chunk)] = e_sub
            return carry

        lax.fori_loop(0, num_l_sub, l_body, 0)

    n_full = t_enc_pad // t_tile
    t_tail = t_enc_pad - n_full * t_tile
    if n_full > 0:
        def t_body(i, carry):
            t_chunk_body(pl.multiple_of(i * t_tile, t_tile), t_tile)
            return carry
        lax.fori_loop(0, n_full, t_body, 0)
    if t_tail > 0:
        t_chunk_body(n_full * t_tile, t_tail)               # static tail tile

    # ---- Phase 2: masked softmax over the (L_TILE, T_pad) energies.
    # Columns >= t_actual (zero-padded enc or never-written scratch) are masked
    # to a large negative BEFORE max/exp so garbage never reaches the softmax.
    energies = energy_ref[...]
    t_ids = lax.broadcasted_iota(jnp.int32, (l_tile, t_pad), 1)
    energies = jnp.where(t_ids < t_actual, energies, jnp.float32(-1e30))
    m = jnp.max(energies, axis=-1, keepdims=True)
    e = jnp.exp(energies - m)
    denom = jnp.sum(e, axis=-1, keepdims=True)
    scores = e * pl.reciprocal(denom, approx=False)         # (L_TILE, T_pad)

    # ---- Phase 3: one lane-dense score store + a single ctx matmul.
    scores_ref[0] = scores.astype(scores_ref.dtype)
    scores_k = scores if t_enc_pad == t_pad else scores[:, :t_enc_pad]
    ctx = jnp.dot(scores_k, enc_ref[0, :, :],
                  preferred_element_type=jnp.float32)       # (L_TILE, E_pad)
    ctx_ref[0] = ctx.astype(ctx_ref.dtype)


def se_alignment_forward(hidden, frame_spk_embeddings, wa_t, va, *,
                         l_tile=128, t_tile=128, l_sub=8,
                         compute_dtype=jnp.float32):
    """Runs VanillaAttention (bahdanau) for every step of `hidden`.

    hidden               : (B, L, Q) float32  (merged hidden states)
    frame_spk_embeddings : (B, T, E) float32  (encoder_outputs)
    wa_t                 : (Q, E)    float32  (Wa.weight transposed)
    va                   : (B, E)    float32
    returns contexts (B, L, E), scores (B, L, T)
    """
    B, L, Q = hidden.shape
    _, T, E = frame_spk_embeddings.shape

    q_pad = _round_up(Q, 128)
    e_pad = _round_up(E, 128)
    t_enc_pad = _round_up(T, 8)      # enc's T is a sublane dim -> x8 only
    t_pad = _round_up(T, 128)        # energies / scores lane dim -> x128

    l_tile = min(l_tile, _round_up(L, 8))
    # v7x has two TensorCores: make sure there are >= 2 grid steps to shard.
    if B * _cdiv(_round_up(L, 8), l_tile) < 2 and L > 8:
        l_tile = _round_up(_cdiv(L, 2), 8)
    l_pad = _round_up(L, l_tile)
    n_l = l_pad // l_tile
    l_sub = min(l_sub, l_tile)

    f32 = jnp.float32
    hidden_p = _pad_to(hidden.astype(f32), (B, l_pad, q_pad))
    enc_p = _pad_to(frame_spk_embeddings.astype(f32), (B, t_enc_pad, e_pad))
    wa_p = _pad_to(wa_t.astype(f32), (q_pad, e_pad))
    va_p = _pad_to(va.astype(f32), (B, e_pad)).reshape(B, 1, e_pad)

    # Hoisted projection: one big MXU matmul (M = B*L_pad).  HIGH (bf16_3x) is
    # ~f32 accurate without HIGHEST's 6-pass decomposition.
    a = jnp.dot(hidden_p.reshape(B * l_pad, q_pad), wa_p,
                preferred_element_type=f32,
                precision=jax.lax.Precision.HIGH).reshape(B, l_pad, e_pad)

    kernel = functools.partial(
        _attention_kernel, t_actual=T, t_enc_pad=t_enc_pad, t_tile=t_tile,
        l_sub=l_sub, compute_dtype=compute_dtype)

    grid_spec = pltpu.PrefetchScalarGridSpec(
        num_scalar_prefetch=0,
        grid=(B, n_l),
        in_specs=[
            pl.BlockSpec((1, l_tile, e_pad), lambda b, l: (b, l, 0)),
            # enc block index is constant over the inner L axis -> not re-DMA'd
            # between consecutive grid steps of the same batch element.
            pl.BlockSpec((1, t_enc_pad, e_pad), lambda b, l: (b, 0, 0)),
            pl.BlockSpec((1, 1, e_pad), lambda b, l: (b, 0, 0)),
        ],
        out_specs=[
            pl.BlockSpec((1, l_tile, e_pad), lambda b, l: (b, l, 0)),
            pl.BlockSpec((1, l_tile, t_pad), lambda b, l: (b, l, 0)),
        ],
        scratch_shapes=[pltpu.VMEM((l_tile, t_pad), jnp.float32)],
    )

    cost = pl.CostEstimate(
        # ctx matmul + elementwise add/mul/reduce in the energy phase.
        flops=6 * B * l_pad * t_enc_pad * e_pad,
        transcendentals=B * l_pad * t_enc_pad * e_pad + B * l_pad * t_pad,
        bytes_accessed=4 * (B * n_l * t_enc_pad * e_pad      # enc per L-tile
                            + 2 * B * l_pad * e_pad          # a in + ctx out
                            + B * l_pad * t_pad              # scores out
                            + B * e_pad),                    # va
    )

    ctx_p, scores_p = pl.pallas_call(
        kernel,
        out_shape=(
            jax.ShapeDtypeStruct((B, l_pad, e_pad), f32),
            jax.ShapeDtypeStruct((B, l_pad, t_pad), f32),
        ),
        grid_spec=grid_spec,
        compiler_params=pltpu.CompilerParams(
            dimension_semantics=("parallel", "parallel"),
            # Budget: enc block 2x(T*E*4) + a/ctx/scores blocks + energy scratch
            # + ~4 MiB of bounded in-kernel temps  ~= 10-12 MiB at production
            # shapes; 40 MiB leaves headroom and stays under v7x's 64 MiB.
            vmem_limit_bytes=40 * 1024 * 1024,
        ),
        cost_estimate=cost,
    )(a, enc_p, va_p)

    # Strip padding (padded scores are exactly 0, padded ctx columns exactly 0).
    return ctx_p[:, :L, :E], scores_p[:, :L, :T]


def se_alignment_reference(hidden, enc, wa_t, va):
    """Pure-JAX reference mirroring the PyTorch VanillaAttention loop."""
    hp = jax.lax.Precision.HIGHEST
    a = jnp.einsum("blq,qe->ble", hidden, wa_t, precision=hp)         # (B,L,E)
    out = jnp.tanh(a[:, :, None, :] + enc[:, None, :, :])             # (B,L,T,E)
    energies = jnp.einsum("blte,be->blt", out, va, precision=hp)      # (B,L,T)
    scores = jax.nn.softmax(energies, axis=-1)                        # (B,L,T)
    contexts = jnp.einsum("blt,bte->ble", scores, enc, precision=hp)  # (B,L,E)
    return contexts, scores


if __name__ == "__main__":
    # Small hparams-consistent shapes:
    #   B = batch, L = T/r merged-hidden length, T = mel frames,
    #   Q = encoder_embedding_dim, E = hparams.E
    # T=144 exercises both the full-128 T tile path and the static tail tile;
    # L=24 exercises the multi-iteration L-subtile fori_loop.
    B, L, T, Q, E = 2, 24, 144, 32, 32

    key = jax.random.PRNGKey(0)
    k_h, k_e, k_w, k_v = jax.random.split(key, 4)

    hidden = jax.random.normal(k_h, (B, L, Q), dtype=jnp.float32)
    frame_spk_embeddings = jax.random.normal(k_e, (B, T, E), dtype=jnp.float32)

    # Wa: nn.Linear(Q, E, bias=False).weight is (E, Q); store transposed (Q, E).
    wa_t = (jax.random.normal(k_w, (E, Q), dtype=jnp.float32) / jnp.sqrt(Q)).T
    # va: nn.init.normal_(va, 0, 0.1), shape (batch_size, E).
    va = 0.1 * jax.random.normal(k_v, (B, E), dtype=jnp.float32)

    contexts, scores = se_alignment_forward(hidden, frame_spk_embeddings, wa_t, va)
    jax.block_until_ready((contexts, scores))

    ref_ctx, ref_scores = se_alignment_reference(hidden, frame_spk_embeddings,
                                                 wa_t, va)
    assert contexts.shape == (B, L, E) and scores.shape == (B, L, T)
    # Scores come from a pure-f32 VPU/EUP path: tight tolerance.
    assert jnp.allclose(scores, ref_scores, atol=1e-4, rtol=1e-4)
    # Contexts go through the in-kernel MXU matmul; allow margin for MXU
    # rounding (observed error in f32 is ~1e-6).
    assert jnp.allclose(contexts, ref_ctx, atol=3e-3, rtol=3e-3)

    print("KERNEL_OK")
</pallas_src>

<mosaic_0001>
module attributes {stable_mosaic.version = 11 : i64} {
  func.func @_attention_kernel(%arg0: i32, %arg1: i32, %arg2: memref<1x24x128xf32, #tpu.memory_space<vmem>>, %arg3: memref<1x144x128xf32, #tpu.memory_space<vmem>>, %arg4: memref<1x1x128xf32, #tpu.memory_space<vmem>>, %arg5: memref<1x24x128xf32, #tpu.memory_space<vmem>>, %arg6: memref<1x24x256xf32, #tpu.memory_space<vmem>>, %arg7: memref<24x256xf32, #tpu.memory_space<vmem>>) attributes {dimension_semantics = [#tpu.dimension_semantics<parallel>, #tpu.dimension_semantics<parallel>], iteration_bounds = array<i64: 2, 1>, scalar_prefetch = 0 : i64, scratch_operands = 1 : i64, tpu.core_type = #tpu.core_type<tc>, window_params = [{transform_indices = @transform_0, window_bounds = array<i64: 1, 24, 128>}, {transform_indices = @transform_1, window_bounds = array<i64: 1, 144, 128>}, {transform_indices = @transform_2, window_bounds = array<i64: 1, 1, 128>}, {transform_indices = @transform_3, window_bounds = array<i64: 1, 24, 128>}, {transform_indices = @transform_4, window_bounds = array<i64: 1, 24, 256>}]} {
    %c0 = arith.constant 0 : index
    %c0_0 = arith.constant 0 : index
    %c0_1 = arith.constant 0 : index
    %0 = vector.load %arg4[%c0, %c0_0, %c0_1] : memref<1x1x128xf32, #tpu.memory_space<vmem>>, vector<1x1x128xf32>
    %1 = vector.shape_cast %0 : vector<1x1x128xf32> to vector<1x128xf32>
    %c0_i32 = arith.constant 0 : i32
    %c128_i32 = arith.constant 128 : i32
    %2 = arith.muli %c0_i32, %c128_i32 : i32
    %3 = tpu.assume_multiple %2, 128 : i32
    %c0_2 = arith.constant 0 : index
    %4 = arith.index_cast %3 : i32 to index
    %c0_3 = arith.constant 0 : index
    %5 = vector.load %arg3[%c0_2, %4, %c0_3] : memref<1x144x128xf32, #tpu.memory_space<vmem>>, vector<1x128x128xf32>
    %6 = vector.shape_cast %5 : vector<1x128x128xf32> to vector<128x128xf32>
    %c0_i32_4 = arith.constant 0 : i32
    %c3_i32 = arith.constant 3 : i32
    %7 = arith.addi %c0_i32_4, %c3_i32 : i32
    %c1_i32 = arith.constant 1 : i32
    scf.for %arg8 = %c0_i32_4 to %7 step %c1_i32  : i32 {
      %c8_i32 = arith.constant 8 : i32
      %37 = arith.muli %arg8, %c8_i32 : i32
      %38 = tpu.assume_multiple %37, 8 : i32
      %c0_27 = arith.constant 0 : index
      %39 = arith.index_cast %38 : i32 to index
      %c0_28 = arith.constant 0 : index
      %40 = vector.load %arg2[%c0_27, %39, %c0_28] : memref<1x24x128xf32, #tpu.memory_space<vmem>>, vector<1x8x128xf32>
      %41 = vector.shape_cast %40 : vector<1x8x128xf32> to vector<8x128xf32>
      %42 = vector.shape_cast %41 : vector<8x128xf32> to vector<8x1x128xf32>
      %43 = vector.shape_cast %6 : vector<128x128xf32> to vector<1x128x128xf32>
      %44 = vector.broadcast %42 : vector<8x1x128xf32> to vector<8x128x128xf32>
      %45 = vector.broadcast %43 : vector<1x128x128xf32> to vector<8x128x128xf32>
      %46 = arith.addf %44, %45 : vector<8x128x128xf32>
      %47 = math.tanh %46 : vector<8x128x128xf32>
      %48 = vector.shape_cast %1 : vector<1x128xf32> to vector<1x1x128xf32>
      %49 = vector.broadcast %48 : vector<1x1x128xf32> to vector<8x128x128xf32>
      %50 = arith.mulf %47, %49 : vector<8x128x128xf32>
      %cst_29 = arith.constant dense<0.000000e+00> : vector<8x128xf32>
      %51 = vector.multi_reduction <add>, %50, %cst_29 [2] : vector<8x128x128xf32> to vector<8x128xf32>
      %52 = arith.index_cast %38 : i32 to index
      %53 = arith.index_cast %3 : i32 to index
      %54 = vector.load %arg7[%52, %53] : memref<24x256xf32, #tpu.memory_space<vmem>>, vector<8x128xf32>
      tpu.vector_store %arg7[%52, %53], %51 {strides = array<i32>} : memref<24x256xf32, #tpu.memory_space<vmem>>, vector<8x128xf32>,
    }
    %c3_i32_5 = arith.constant 3 : i32
    %c1_i32_6 = arith.constant 1 : i32
    %c0_7 = arith.constant 0 : index
    %c128 = arith.constant 128 : index
    %c0_8 = arith.constant 0 : index
    %8 = vector.load %arg3[%c0_7, %c128, %c0_8] : memref<1x144x128xf32, #tpu.memory_space<vmem>>, vector<1x16x128xf32>
    %9 = vector.shape_cast %8 : vector<1x16x128xf32> to vector<16x128xf32>
    %c0_i32_9 = arith.constant 0 : i32
    %c3_i32_10 = arith.constant 3 : i32
    %10 = arith.addi %c0_i32_9, %c3_i32_10 : i32
    %c1_i32_11 = arith.constant 1 : i32
    scf.for %arg8 = %c0_i32_9 to %10 step %c1_i32_11  : i32 {
      %c8_i32 = arith.constant 8 : i32
      %37 = arith.muli %arg8, %c8_i32 : i32
      %38 = tpu.assume_multiple %37, 8 : i32
      %c0_27 = arith.constant 0 : index
      %39 = arith.index_cast %38 : i32 to index
      %c0_28 = arith.constant 0 : index
      %40 = vector.load %arg2[%c0_27, %39, %c0_28] : memref<1x24x128xf32, #tpu.memory_space<vmem>>, vector<1x8x128xf32>
      %41 = vector.shape_cast %40 : vector<1x8x128xf32> to vector<8x128xf32>
      %42 = vector.shape_cast %41 : vector<8x128xf32> to vector<8x1x128xf32>
      %43 = vector.shape_cast %9 : vector<16x128xf32> to vector<1x16x128xf32>
      %44 = vector.broadcast %42 : vector<8x1x128xf32> to vector<8x16x128xf32>
      %45 = vector.broadcast %43 : vector<1x16x128xf32> to vector<8x16x128xf32>
      %46 = arith.addf %44, %45 : vector<8x16x128xf32>
      %47 = math.tanh %46 : vector<8x16x128xf32>
      %48 = vector.shape_cast %1 : vector<1x128xf32> to vector<1x1x128xf32>
      %49 = vector.broadcast %48 : vector<1x1x128xf32> to vector<8x16x128xf32>
      %50 = arith.mulf %47, %49 : vector<8x16x128xf32>
      %cst_29 = arith.constant dense<0.000000e+00> : vector<8x16xf32>
      %51 = vector.multi_reduction <add>, %50, %cst_29 [2] : vector<8x16x128xf32> to vector<8x16xf32>
      %52 = arith.index_cast %38 : i32 to index
      %c128_30 = arith.constant 128 : index
      %53 = vector.load %arg7[%52, %c128_30] : memref<24x256xf32, #tpu.memory_space<vmem>>, vector<8x16xf32>
      tpu.vector_store %arg7[%52, %c128_30], %51 {strides = array<i32>} : memref<24x256xf32, #tpu.memory_space<vmem>>, vector<8x16xf32>,
    }
    %c3_i32_12 = arith.constant 3 : i32
    %c0_13 = arith.constant 0 : index
    %c0_14 = arith.constant 0 : index
    %11 = vector.load %arg7[%c0_13, %c0_14] : memref<24x256xf32, #tpu.memory_space<vmem>>, vector<24x256xf32>
    %12 = tpu.iota {dimensions = array<i32: 1>} : vector<24x256xi32>
    %c144_i32 = arith.constant 144 : i32
    %13 = vector.broadcast %c144_i32 : i32 to vector<24x256xi32>
    %14 = arith.cmpi slt, %12, %13 : vector<24x256xi32>
    %cst = arith.constant -1.000000e+30 : f32
    %15 = vector.broadcast %cst : f32 to vector<24x256xf32>
    %16 = arith.select %14, %11, %15 : vector<24x256xi1>, vector<24x256xf32>
    %cst_15 = arith.constant dense<0xFF800000> : vector<24xf32>
    %17 = vector.multi_reduction <maximumf>, %16, %cst_15 [1] : vector<24x256xf32> to vector<24xf32>
    %18 = vector.shape_cast %17 : vector<24xf32> to vector<24x1xf32>
    %19 = vector.broadcast %18 : vector<24x1xf32> to vector<24x256xf32>
    %20 = arith.subf %16, %19 : vector<24x256xf32>
    %21 = math.exp %20 : vector<24x256xf32>
    %cst_16 = arith.constant dense<0.000000e+00> : vector<24xf32>
    %22 = vector.multi_reduction <add>, %21, %cst_16 [1] : vector<24x256xf32> to vector<24xf32>
    %23 = vector.shape_cast %22 : vector<24xf32> to vector<24x1xf32>
    %24 = tpu.reciprocal %23 : vector<24x1xf32> -> vector<24x1xf32>
    %25 = vector.broadcast %24 : vector<24x1xf32> to vector<24x256xf32>
    %26 = arith.mulf %21, %25 : vector<24x256xf32>
    %c0_17 = arith.constant 0 : index
    %c0_18 = arith.constant 0 : index
    %c0_19 = arith.constant 0 : index
    %27 = vector.load %arg6[%c0_17, %c0_18, %c0_19] : memref<1x24x256xf32, #tpu.memory_space<vmem>>, vector<1x24x256xf32>
    %28 = vector.shape_cast %27 : vector<1x24x256xf32> to vector<24x256xf32>
    %29 = vector.shape_cast %26 : vector<24x256xf32> to vector<1x24x256xf32>
    tpu.vector_store %arg6[%c0_17, %c0_18, %c0_19], %29 {strides = array<i32>} : memref<1x24x256xf32, #tpu.memory_space<vmem>>, vector<1x24x256xf32>,
    %30 = vector.extract_strided_slice %26 {offsets = [0, 0], sizes = [24, 144], strides = [1, 1]} : vector<24x256xf32> to vector<24x144xf32>
    %c0_20 = arith.constant 0 : index
    %c0_21 = arith.constant 0 : index
    %c0_22 = arith.constant 0 : index
    %31 = vector.load %arg3[%c0_20, %c0_21, %c0_22] : memref<1x144x128xf32, #tpu.memory_space<vmem>>, vector<1x144x128xf32>
    %32 = vector.shape_cast %31 : vector<1x144x128xf32> to vector<144x128xf32>
    %cst_23 = arith.constant dense<0.000000e+00> : vector<24x128xf32>
    %33 = tpu.matmul %30, %32, %cst_23 {dimension_numbers = #tpu.dot_dimension_numbers<[1], [0], [0], [1], [0, 0, 1, 1], [], []>} : vector<24x144xf32>, vector<144x128xf32>, vector<24x128xf32> -> vector<24x128xf32>
    %c0_24 = arith.constant 0 : index
    %c0_25 = arith.constant 0 : index
    %c0_26 = arith.constant 0 : index
    %34 = vector.load %arg5[%c0_24, %c0_25, %c0_26] : memref<1x24x128xf32, #tpu.memory_space<vmem>>, vector<1x24x128xf32>
    %35 = vector.shape_cast %34 : vector<1x24x128xf32> to vector<24x128xf32>
    %36 = vector.shape_cast %33 : vector<24x128xf32> to vector<1x24x128xf32>
    tpu.vector_store %arg5[%c0_24, %c0_25, %c0_26], %36 {strides = array<i32>} : memref<1x24x128xf32, #tpu.memory_space<vmem>>, vector<1x24x128xf32>,
    return
  }
  func.func @transform_0(%arg0: i32, %arg1: i32) -> (i32, i32, i32) {
    %c0_i32 = arith.constant 0 : i32
    %c0_i32_0 = arith.constant 0 : i32
    return %arg0, %arg1, %c0_i32 : i32, i32, i32
  }
  func.func @transform_1(%arg0: i32, %arg1: i32) -> (i32, i32, i32) {
    %c0_i32 = arith.constant 0 : i32
    %c0_i32_0 = arith.constant 0 : i32
    %c0_i32_1 = arith.constant 0 : i32
    return %arg0, %c0_i32, %c0_i32_0 : i32, i32, i32
  }
  func.func @transform_2(%arg0: i32, %arg1: i32) -> (i32, i32, i32) {
    %c0_i32 = arith.constant 0 : i32
    %c0_i32_0 = arith.constant 0 : i32
    %c0_i32_1 = arith.constant 0 : i32
    return %arg0, %c0_i32, %c0_i32_0 : i32, i32, i32
  }
  func.func @transform_3(%arg0: i32, %arg1: i32) -> (i32, i32, i32) {
    %c0_i32 = arith.constant 0 : i32
    %c0_i32_0 = arith.constant 0 : i32
    return %arg0, %arg1, %c0_i32 : i32, i32, i32
  }
  func.func @transform_4(%arg0: i32, %arg1: i32) -> (i32, i32, i32) {
    %c0_i32 = arith.constant 0 : i32
    %c0_i32_0 = arith.constant 0 : i32
    return %arg0, %arg1, %c0_i32 : i32, i32, i32
  }
}

</mosaic_0001>

<bundles_post_ra>
// kernel: tpu_custom_call.1
= control target key start
LH: loop header
LB: loop body
LE: loop exit
PB: predicated region body
PF: predicated region fallthrough
CT: control target
= control target key end

     0   :  { %10 = vsyncpa [#allocation4], 0  ;;  %s4561_s0 = inlined_call_operand.hbm [shape: f32[2,24,128], index: 0, kind: input, shape index: {}]   ;;  %s4562_s1 = inlined_call_operand.hbm [shape: f32[2,144,128], index: 1, kind: input, shape index: {}]   ;;  %s4563_s2 = inlined_call_operand.vmem [shape: f32[2,1,128], index: 2, kind: input, shape index: {}]   ;;  %s4564_s3 = inlined_call_operand.hbm [shape: f32[2,24,128], index: 3, kind: output, shape index: {0}]   ;;  %s4565_s4 = inlined_call_operand.hbm [shape: f32[2,24,256], index: 4, kind: output, shape index: {1}]  }
   0x1   :  { %12 = vsyncpa [#allocation4 + $0x1], 0 }
   0x2   :  { %13 = vsyncpa [#allocation7], 0 }
   0x3   :  { %15 = vsyncpa [#allocation7 + $0x1], 0 }
   0x4   :  { %16 = vsyncpa [#allocation5], 0 }
   0x5   :  { %18 = vsyncpa [#allocation5 + $0x1], 0 }
   0x6   :  { %19 = vsyncpa [#allocation10], 0 }
   0x7   :  { %21 = vsyncpa [#allocation10 + $0x1], 0  ;;  %s3287_s15 = smov 0   ;;  %s3289_s16 = smov 0  }
   0x8   :  { %s3291_s17 = smov 0   ;;  %s3293_s18 = smov 0  }
   0x9   :  { %s3295_s19 = smov 0   ;;  %s3297_s20 = smov 0  }
   0xa LB: > { %s2573_s21 = sadd.s32 4294967295, %s3240_s20   ;;  %s2574_s22 = sadd.s32 4294967294, %s3240_s20   ;;  %s3240_s20 = sphi %s3297_s20, %s27_s20   ;;  %s3236_s19 = sphi %s3295_s19, %s4591_s19   ;;  %s3232_s18 = sphi %s3293_s18, %s4590_s18   ;;  %s3228_s17 = sphi %s3291_s17, %s4589_s17   ;;  %s3224_s16 = sphi %s3289_s16, %s4588_s16   ;;  %s3220_s15 = sphi %s3287_s15, %s4587_s15  }
   0xb   : > { %s39_s23 = sadd.s32 1, %s3236_s19  ;;  %s48_s24 = sadd.s32 1, %s3228_s17 }
   0xc   : > { %p41_p0 = scmp.ge.s32.totalorder %s39_s23, 2  ;;  %p55_p1 = scmp.ne.s32.totalorder %s3228_s17, %s3224_s16 }
   0xd   : > { %p56_p2 = scmp.eq.s32.totalorder %s3240_s20, 0  ;;  %p61_p3 = scmp.ne.s32.totalorder %s3224_s16, %s3220_s15 }
   0xe   : > { %s4593_s23 = smov (%p41_p0, %s39_s23), 0  ;;  %p62_p5 = scmp.eq.s32.totalorder %s2573_s21, 0 }
   0xf   : > { %p3328_p4 = por %p56_p2, %p55_p1  ;;  %s43_s26 = ssub.s32 %s3236_s19, %s4593_s23 }
  0x10   : > { %p139_p6 = scmp.eq.s32.totalorder %s2573_s21, 1  ;;  %p46_p7 = scmp.eq.s32.totalorder %s43_s26, 0 }
  0x11   : > { %p3334_p8 = por %p62_p5, %p61_p3  ;;  %p145_p10 = scmp.eq.s32.totalorder %s2574_s22, 1 }
  0x12   : > { %p3338_p9 = por %p139_p6, %p55_p1  ;;  %p2672_p13 = scmp.lt.s32.totalorder %s3240_s20, 2 }
  0x13   : > { %s4573_s27 = scalar_select %p3334_p8, 1, 0 }
  0x14   : > { %s4574_s28 = scalar_select %p3338_p9, 1, 0 }
  0x15   : > { %s3343_s29 = scalar_select %p46_p7, %s3228_s17, %s48_s24  }
  0x16   : > { %p3345_p11 = por %p145_p10, %p61_p3  ;;  %s3352_s5 = sand.u32 1, %s3228_s17  }
  0x17   : > { %s2641_s6 = smul.u32 24, %s3352_s5  ;;  %p3358_p0 = pnand %p2672_p13, %p3328_p4 }
  0x18   : > { %s4575_s30 = scalar_select %p3345_p11, 1, 0 }
  0x19   : > { %s2642_s7 = smul.u32 384, %s3236_s19  ;;  %s197_s12 = scalar_lea.vmem [#allocation3], %s2641_s6 }
  0x1a   : > { %s206_s13 = sshll.u32 %s197_s12, 4  ;;  %s194_s14 = scalar_lea.sflag [#allocation4], %s3352_s5  ;;  %s3367_s13 = int_to_ptr.vmem [resolvable:$true] %s206_s13 }
  0x1b   : > { %s3365_s11 = scalar_lea.hbm %s4561_s0, %s2642_s7  ;;  %p3056_p3 = pneg %p3358_p0 }
  0x1c   : > { %s3054_s21 = scalar_lea.hbm %s3365_s11, 384  ;;  %s3059_s25 = scalar_lea.hbm %s4561_s0, 768 }
  0x1d   : > { %p3055_p2 = scmp.ne.s32.totalorder %s3365_s11, %s3054_s21  ;;  %p3060_p6 = scmp.lt.u32.totalorder %s3365_s11, %s4561_s0 }
  0x1e   : > { %p3061_p7 = scmp.lt.u32.totalorder %s3059_s25, %s3054_s21  ;;  %p3063_p13 = scmp.lt.u32.totalorder %s3054_s21, %s3365_s11 }
  0x1f   : > { %p3057_p4 = pnand %p3056_p3, %p3055_p2 }
  0x20   : > { %p3062_p10 = por %p3061_p7, %p3060_p6 }
  0x21   : > { %p3058_p5 = pneg %p3057_p4 }
  0x22   : > { %p3064_p12 = por %p3063_p13, %p3062_p10 }
  0x24   : > { %p3065_p1 = pnand %p3064_p12, %p3058_p5 }
  0x26   : > { %3068 = shalt.err (!%p3065_p1)
}
  0x27   : > { %s3069_s6 = scalar_lea.vmem %s3367_s13, 384  ;;  %s3250_s9 = smov [#allocation3]  }
  0x28   : > { %p3070_p2 = scmp.ne.s32.totalorder %s3367_s13, %s3069_s6  ;;  %s3074_s10 = sshll.u32 %s3250_s9, 4  ;;  %s3075_s10 = int_to_ptr.vmem [resolvable:$false] %s3074_s10 }
  0x29   : > { %s3076_s12 = scalar_lea.vmem %s3075_s10, 768  ;;  %p3077_p9 = scmp.lt.s32.totalorder %s3367_s13, %s3075_s10 }
  0x2a   : > { %p3072_p4 = pnand %p3070_p2, %p3056_p3  ;;  %p3078_p6 = scmp.lt.s32.totalorder %s3076_s12, %s3069_s6 }
  0x2c   : > { %p3073_p11 = pneg %p3072_p4  ;;  %p3079_p7 = por %p3078_p6, %p3077_p9 }
  0x2e   : > { %p3080_p10 = pnand %p3079_p7, %p3073_p11 }
  0x30   : > { %3083 = shalt.err (!%p3080_p10)
}
  0x31   : > { %s4567_s21 = smov 128   ;;  %s3252_s22 = smov 8  }
  0x32   : > { %2661 = dma.hbm_to_vmem [thread:$0]  (!%p3358_p0), %s3365_s11, 384, %s3367_s13, %s194_s14, %s4567_s21, %s4567_s21, %s3252_s22  }
  0x33   : > { %p241_p9 = scmp.lt.s32.totalorder %s3240_s20, 3  ;;  %s2643_s24 = smul.u32 144, %s3352_s5 }
  0x34   : > { %p4577_p11 = scmp.ge.s32.totalorder %s3240_s20, 1  ;;  %s2644_s26 = smul.u32 2304, %s3236_s19 }
  0x35   : > { %s220_s10 = scalar_lea.vmem [#allocation6], %s2643_s24  ;;  %s217_s11 = scalar_lea.sflag [#allocation7], %s3352_s5 }
  0x36   : > { %p3405_p12 = pnand %p4577_p11, %p241_p9  ;;  %s3413_s9 = scalar_lea.hbm %s4562_s1, %s2644_s26 }
  0x37   : > { %s227_s12 = sshll.u32 %s220_s10, 4  ;;  %s3084_s13 = scalar_lea.hbm %s3413_s9, 2304  ;;  %s3415_s12 = int_to_ptr.vmem [resolvable:$true] %s227_s12 }
  0x38   : > { %p3085_p1 = scmp.ne.s32.totalorder %s3413_s9, %s3084_s13  ;;  %s3089_s26 = scalar_lea.hbm %s4562_s1, 4608 }
  0x39   : > { %p3090_p2 = scmp.lt.u32.totalorder %s3413_s9, %s4562_s1  ;;  %p3091_p4 = scmp.lt.u32.totalorder %s3089_s26, %s3084_s13 }
  0x3a   : > { %p3087_p5 = pnand %p3085_p1, %p3056_p3  ;;  %p3093_p7 = scmp.lt.u32.totalorder %s3084_s13, %s3413_s9 }
  0x3b   : > { %p3092_p6 = por %p3091_p4, %p3090_p2 }
  0x3c   : > { %p3088_p13 = pneg %p3087_p5 }
  0x3d   : > { %p3094_p10 = por %p3093_p7, %p3092_p6 }
  0x3f   : > { %p3095_p9 = pnand %p3094_p10, %p3088_p13 }
  0x41   : > { %3098 = shalt.err (!%p3095_p9)
}
  0x42   : > { %s3099_s24 = scalar_lea.vmem %s3415_s12, 2304  ;;  %s3253_s21 = smov [#allocation6]  }
  0x43   : > { %p3100_p11 = scmp.ne.s32.totalorder %s3415_s12, %s3099_s24  ;;  %s3104_s10 = sshll.u32 %s3253_s21, 4  ;;  %s3105_s10 = int_to_ptr.vmem [resolvable:$false] %s3104_s10 }
  0x44   : > { %s3106_s14 = scalar_lea.vmem %s3105_s10, 4608  ;;  %p3107_p8 = scmp.lt.s32.totalorder %s3415_s12, %s3105_s10 }
  0x45   : > { %p3102_p1 = pnand %p3100_p11, %p3056_p3  ;;  %p3108_p2 = scmp.lt.s32.totalorder %s3106_s14, %s3099_s24 }
  0x47   : > { %p3103_p5 = pneg %p3102_p1  ;;  %p3109_p4 = por %p3108_p2, %p3107_p8 }
  0x49   : > { %p3110_p6 = pnand %p3109_p4, %p3103_p5 }
  0x4b   : > { %3113 = shalt.err (!%p3110_p6)
}
  0x4c   : > { %s4579_s13 = smov 128   ;;  %245 = sbr.rel (%p3405_p12) target bundleno = 1283 (0x503), region = 32 }
  0x4d   : > { %2664 = dma.hbm_to_vmem [thread:$0]  (!%p3358_p0), %s3413_s9, 2304, %s3415_s12, %s217_s11, %s4579_s13, %s4579_s13, %s3252_s22  }
  0x4e   : > { %s3449_s26 = sand.u32 (!%p3405_p12), 1, %s3224_s16   ;;  %p4580_p8 = scmp.ne.s32.totalorder (!%p3405_p12), %s4573_s27, 0 }
  0x4f   : > { %s2645_s7 = smul.u32 (!%p3405_p12), 24, %s3449_s26  ;;  %s248_s8 = scalar_lea.sflag (!%p3405_p12), [#allocation4], %s3449_s26 }
  0x51   : > { %s3455_s6 = scalar_lea.vmem (!%p3405_p12), [#allocation3], %s2645_s7 }
  0x53   : > { %3203 = dma.done.wait (%p4580_p8), %s248_s8, 384  }
  0x54   : > { %3205 = vsyncadd (%p4580_p8), %s248_s8, 4294966912  ;;  %s2646_s5 = smul.u32 144, %s3449_s26  ;;  %s257_s22 = scalar_lea.sflag [#allocation7], %s3449_s26 }
  0x56   : > { %s3463_s25 = scalar_lea.vmem [#allocation6], %s2646_s5 }
  0x57   : > { %3207 = dma.done.wait (%p4580_p8), %s257_s22, 2304  }
  0x58   : > { %3209 = vsyncadd (%p4580_p8), %s257_s22, 4294964992  ;;  %p299_p0 = scmp.lt.s32.totalorder %s3232_s18, 1  ;;  %s2647_s9 = smul.u32 48, %s3449_s26  ;;  %v3478_v1 = vld [vmem:[%s3463_s25] sm:$0xff]  ;;  %v3481_v2 = vld [vmem:[%s3463_s25 + $0x8] sm:$0xff] }
  0x59   : > { %v3484_v3 = vld [vmem:[%s3463_s25 + $0x10] sm:$0xff]  ;;  %v3487_v4 = vld [vmem:[%s3463_s25 + $0x18] sm:$0xff]  ;;  %v3490_v5 = vld [vmem:[%s3463_s25 + $0x20] sm:$0xff]  ;;  %s3527_s21 = scalar_lea.vmem [#allocation8], %s2645_s7  ;;  %s3531_s14 = smov 0  }
  0x5a   : > { %s300_s27 = scalar_select %p299_p0, %s3232_s18, 1  ;;  %v3493_v6 = vld [vmem:[%s3463_s25 + $0x28] sm:$0xff]  ;;  %v3496_v7 = vld [vmem:[%s3463_s25 + $0x30] sm:$0xff]  ;;  %v3499_v8 = vld [vmem:[%s3463_s25 + $0x38] sm:$0xff] }
  0x5b   : > { %v3502_v9 = vld [vmem:[%s3463_s25 + $0x40] sm:$0xff]  ;;  %v3505_v10 = vld [vmem:[%s3463_s25 + $0x48] sm:$0xff]  ;;  %v3508_v11 = vld [vmem:[%s3463_s25 + $0x50] sm:$0xff]  ;;  %s3529_s10 = scalar_lea.vmem [#allocation9], %s2647_s9 }
  0x5c   : > { %s301_s24 = scalar_lea.vmem %s4563_s2, %s300_s27  ;;  %v3511_v12 = vld [vmem:[%s3463_s25 + $0x58] sm:$0xff]  ;;  %v3514_v13 = vld [vmem:[%s3463_s25 + $0x60] sm:$0xff]  ;;  %v3517_v14 = vld [vmem:[%s3463_s25 + $0x68] sm:$0xff] }
  0x5d   : > { %v3475_v0 = vld [vmem:[%s301_s24] ss:$0 sm:$0xff]  ;;  %v3523_v16 = vld [vmem:[%s3463_s25 + $0x78] sm:$0xff] }
  0x5e   : > { %v3520_v15 = vld [vmem:[%s3463_s25 + $0x70] sm:$0xff] }
  0x5f LB: >> { %v335_v17 = vlaneseq  ;;  %v3254_v18 = vmov 1966171168   ;;  %s2580_s13 = sshll.u32 %s3244_s14, 3  ;;  %vm1205_vm0 = vcmask 130112   ;;  %vm1212_vm1 = vcmask 195712   ;;  %s326_s14 = sadd.s32 1, %s3244_s14   ;;  %s3244_s14 = sphi %s3531_s14, %s326_s14  }
  0x60   : >> { %v333_v19 = vunpack.c.l.s4 %v3254_v18  ;;  %s328_s7 = scalar_lea.vmem %s3455_s6, %s2580_s13 [#allocation3]  ;;  %vm1219_vm2 = vcmask 261312   ;;  %vm1226_vm3 = vcmask 326912   ;;  %vm1233_vm4 = vcmask 392512   ;;  %s1873_s8 = sshra.s32 %s2580_s13, 3 }
  0x61   : >> { %v3538_v20 = vshrl.u32 %v335_v17, 7  ;;  %v329_v22 = vld [vmem:[%s328_s7] sm:$0xff]  ;;  %vm1240_vm5 = vcmask 458112   ;;  %vm1247_vm6 = vcmask 523712   ;;  %vm1254_vm7 = vcmask 589312   ;;  %s2593_s5 = sshll.u32 %s1873_s8, 4 }
  0x62   : >> { %v334_v21 = vunpack.c.0.s8 %v333_v19  ;;  %v331_v24 = vcombine.high %v329_v22, %v329_v22  ;;  %vm1261_vm8 = vcmask 654912   ;;  %vm1268_vm9 = vcmask 720512   ;;  %s1878_s22 = scalar_lea.vmem [#allocation2], %s2593_s5  ;;  %p323_p3 = scmp.ge.s32.totalorder %s326_s14, 3  }
  0x63   : >> { %v3548_v26 = vsub.s32 0, %v3538_v20  ;;  %vm1275_vm10 = vcmask 786112   ;;  %vm1282_vm11 = vcmask 851712   ;;  %vm1289_vm12 = vcmask 917312   ;;  %s4315_s9 = smov (%p323_p3), 0  }
  0x64   : >> { %v3544_v23 = vsub.s32 %v334_v21, %v3538_v20  ;;  %vm1296_vm13 = vcmask 982912   ;;  %vm1303_vm14 = vcmask 1048512   ;;  %vm4569_vm15 = vcmask 1041409  }
  0x66   : >> { %v338_v25 = vrot.slane %v329_v22, %v3544_v23  ;;  %v3551_v27 = vrot.slane %v331_v24, %v3544_v23 }
  0x68   : >> { %v3554_v28 = vrot.slane %v338_v25, %v3544_v23  ;;  %v3558_v29 = vrot.slane %v3551_v27, %v3544_v23  ;;  %v346_v47 = vcombine.high %v338_v25, %v338_v25 }
  0x6a   : >> { %v383_v30 = vrot.slane %v3554_v28, %v3548_v26  ;;  %v3580_v55 = vrot.slane %v346_v47, %v3544_v23 }
  0x6c   : >> { %v422_v31 = vadd.f32 %v383_v30, %v3484_v3  ;;  %v420_v32 = vadd.f32 %v383_v30, %v3478_v1  ;;  %v423_v33 = vadd.f32 %v383_v30, %v3487_v4  ;;  %v421_v34 = vadd.f32 %v383_v30, %v3481_v2 }
  0x6d   : >> { %v425_v35 = vadd.f32 %v383_v30, %v3493_v6  ;;  %v424_v36 = vadd.f32 %v383_v30, %v3490_v5  ;;  %v427_v37 = vadd.f32 %v383_v30, %v3499_v8  ;;  %v426_v38 = vadd.f32 %v383_v30, %v3496_v7 }
  0x6e   : >> { %2747 = vtanh.f32 %v422_v31  ;;  %v429_v39 = vadd.f32 %v383_v30, %v3505_v10  ;;  %v428_v40 = vadd.f32 %v383_v30, %v3502_v9  ;;  %v431_v46 = vadd.f32 %v383_v30, %v3511_v12 }
  0x6f   : >> { %2749 = vtanh.f32 %v420_v32  ;;  %v430_v50 = vadd.f32 %v383_v30, %v3508_v11  ;;  %v433_v54 = vadd.f32 %v383_v30, %v3517_v14  ;;  %v432_v57 = vadd.f32 %v383_v30, %v3514_v13 }
  0x70   : >> { %2751 = vtanh.f32 %v423_v33  ;;  %v435_v61 = vadd.f32 %v383_v30, %v3523_v16  ;;  %v3588_v62 = vrot.slane %v3580_v55, %v3548_v26  ;;  %v434_v18 = vadd.f32 %v383_v30, %v3520_v15 }
  0x71   : >> { %2753 = vtanh.f32 %v421_v34 }
  0x72   : >> { %2755 = vtanh.f32 %v425_v35  ;;  %v437_v24 = vadd.f32 %v3588_v62, %v3481_v2  ;;  %v436_v31 = vadd.f32 %v3588_v62, %v3478_v1  ;;  %v439_v34 = vadd.f32 %v3588_v62, %v3487_v4 }
  0x73   : >> { %2757 = vtanh.f32 %v424_v36  ;;  %v438_v36 = vadd.f32 %v3588_v62, %v3484_v3 }
  0x74   : >> { %2759 = vtanh.f32 %v427_v37 }
  0x75   : >> { %2761 = vtanh.f32 %v426_v38 }
  0x76   : >> { %2763 = vtanh.f32 %v429_v39 }
  0x77   : >> { %2765 = vtanh.f32 %v428_v40  ;;  %v441_v40 = vadd.f32 %v3588_v62, %v3493_v6 }
  0x78   : >> { %v2748_v41 = vpop.eup %2747  ;;  %2767 = vtanh.f32 %v431_v46  ;;  %v443_v46 = vadd.f32 %v3588_v62, %v3499_v8 }
  0x79   : >> { %v2750_v42 = vpop.eup %2749  ;;  %v684_v43 = vmul.f32 %v2748_v41, %v3475_v0  ;;  %2769 = vtanh.f32 %v430_v50 }
  0x7a   : >> { %v2752_v44 = vpop.eup %2751  ;;  %v682_v45 = vmul.f32 %v2750_v42, %v3475_v0  ;;  %2771 = vtanh.f32 %v433_v54  ;;  %v440_v42 = vadd.f32 %v3588_v62, %v3490_v5  ;;  %v444_v54 = vadd.f32 %v3588_v62, %v3502_v9 }
  0x7b   : >> { %v2754_v48 = vpop.eup %2753  ;;  %814 = vadd.xlane.f32.xlu1 %v684_v43  ;;  %v685_v49 = vmul.f32 %v2752_v44, %v3475_v0  ;;  %2773 = vtanh.f32 %v432_v57 }
  0x7c   : >> { %v2756_v51 = vpop.eup %2755  ;;  %810 = vadd.xlane.f32.xlu0 %v682_v45  ;;  %v683_v52 = vmul.f32 %v2754_v48, %v3475_v0  ;;  %2775 = vtanh.f32 %v435_v61  ;;  %v442_v48 = vadd.f32 %v3588_v62, %v3496_v7  ;;  %v446_v61 = vadd.f32 %v3588_v62, %v3508_v11 }
  0x7d   : >> { %v2758_v53 = vpop.eup %2757  ;;  %v687_v56 = vmul.f32 %v2756_v51, %v3475_v0  ;;  %2777 = vtanh.f32 %v434_v18 }
  0x7e   : >> { %v2760_v58 = vpop.eup %2759  ;;  %v686_v59 = vmul.f32 %v2758_v53, %v3475_v0  ;;  %2779 = vtanh.f32 %v437_v24  ;;  %v376_v24 = vcombine.high %v3554_v28, %v3554_v28 }
  0x7f   : >> { %816 = vadd.xlane.f32.xlu1 %v685_v49  ;;  %v2762_v60 = vpop.eup %2761  ;;  %v689_v63 = vmul.f32 %v2760_v58, %v3475_v0  ;;  %2781 = vtanh.f32 %v436_v31 }
  0x80   : >> { %812 = vadd.xlane.f32.xlu0 %v683_v52  ;;  %v2764_v19 = vpop.eup %2763  ;;  %v688_v21 = vmul.f32 %v2762_v60, %v3475_v0  ;;  %2783 = vtanh.f32 %v439_v34  ;;  %v445_v52 = vadd.f32 %v3588_v62, %v3505_v10  ;;  %v451_v34 = vadd.f32 %v3588_v62, %v3523_v16 }
  0x81   : >> { %v2766_v22 = vpop.eup %2765  ;;  %v691_v25 = vmul.f32 %v2764_v19, %v3475_v0  ;;  %2785 = vtanh.f32 %v438_v36  ;;  %v347_v19 = vcombine.high %v3551_v27, %v3551_v27  ;;  %v3645_v28 = vrot.slane %v376_v24, %v3548_v26 }
  0x82   : >> { %v2768_v32 = vpop.eup %2767  ;;  %v690_v30 = vmul.f32 %v2766_v22, %v3475_v0  ;;  %2787 = vtanh.f32 %v441_v40  ;;  %v449_v22 = vadd.f32 %v3588_v62, %v3517_v14  ;;  %v450_v36 = vadd.f32 %v3588_v62, %v3520_v15 }
  0x83   : >> { %820 = vadd.xlane.f32.xlu1 %v687_v56  ;;  %v2770_v33 = vpop.eup %2769  ;;  %v693_v35 = vmul.f32 %v2768_v32, %v3475_v0  ;;  %2789 = vtanh.f32 %v440_v42  ;;  %v448_v32 = vadd.f32 %v3588_v62, %v3514_v13  ;;  %v453_v40 = vadd.f32 %v3645_v28, %v3481_v2 }
  0x84   : >> { %818 = vadd.xlane.f32.xlu0 %v686_v59  ;;  %v2772_v37 = vpop.eup %2771  ;;  %v692_v38 = vmul.f32 %v2770_v33, %v3475_v0  ;;  %2791 = vtanh.f32 %v443_v46  ;;  %v447_v59 = vadd.f32 %v3588_v62, %v3511_v12  ;;  %v452_v42 = vadd.f32 %v3645_v28, %v3478_v1 }
  0x85   : >> { %v2774_v39 = vpop.eup %2773  ;;  %v695_v41 = vmul.f32 %v2772_v37, %v3475_v0  ;;  %2793 = vtanh.f32 %v442_v48 }
  0x86   : >> { %v2776_v43 = vpop.eup %2775  ;;  %v694_v44 = vmul.f32 %v2774_v39, %v3475_v0  ;;  %2795 = vtanh.f32 %v445_v52 }
  0x87   : >> { %824 = vadd.xlane.f32.xlu1 %v689_v63  ;;  %v2778_v45 = vpop.eup %2777  ;;  %v697_v47 = vmul.f32 %v2776_v43, %v3475_v0  ;;  %2797 = vtanh.f32 %v444_v54 }
  0x88   : >> { %822 = vadd.xlane.f32.xlu0 %v688_v21  ;;  %v2780_v49 = vpop.eup %2779  ;;  %v696_v50 = vmul.f32 %v2778_v45, %v3475_v0  ;;  %2799 = vtanh.f32 %v447_v59  ;;  %v455_v45 = vadd.f32 %v3645_v28, %v3487_v4 }
  0x89   : >> { %v2782_v51 = vpop.eup %2781  ;;  %v699_v53 = vmul.f32 %v2780_v49, %v3475_v0  ;;  %2801 = vtanh.f32 %v446_v61 }
  0x8a   : >> { %v2784_v56 = vpop.eup %2783  ;;  %v698_v57 = vmul.f32 %v2782_v51, %v3475_v0  ;;  %2803 = vtanh.f32 %v449_v22  ;;  %v457_v51 = vadd.f32 %v3645_v28, %v3493_v6  ;;  %v460_v22 = vadd.f32 %v3645_v28, %v3502_v9 }
  0x8b   : >> { %828 = vadd.xlane.f32.xlu1 %v691_v25  ;;  %v2786_v58 = vpop.eup %2785  ;;  %v701_v60 = vmul.f32 %v2784_v56, %v3475_v0  ;;  %v3636_v25 = vrot.slane %v347_v19, %v3544_v23  ;;  %2805 = vtanh.f32 %v448_v32  ;;  %v461_v19 = vadd.f32 %v3645_v28, %v3505_v10 }
  0x8c   : >> { %826 = vadd.xlane.f32.xlu0 %v690_v30  ;;  %v2788_v63 = vpop.eup %2787  ;;  %v700_v18 = vmul.f32 %v2786_v58, %v3475_v0  ;;  %2807 = vtanh.f32 %v451_v34  ;;  %v459_v58 = vadd.f32 %v3645_v28, %v3499_v8 }
  0x8d   : >> { %v2790_v21 = vpop.eup %2789  ;;  %v703_v31 = vmul.f32 %v2788_v63, %v3475_v0  ;;  %2809 = vtanh.f32 %v450_v36 }
  0x8e   : >> { %v2792_v30 = vpop.eup %2791  ;;  %v702_v27 = vmul.f32 %v2790_v21, %v3475_v0  ;;  %2811 = vtanh.f32 %v453_v40  ;;  %v464_v40 = vadd.f32 %v3645_v28, %v3514_v13 }
  0x8f   : >> { %832 = vadd.xlane.f32.xlu1 %v693_v35  ;;  %v2794_v33 = vpop.eup %2793  ;;  %v705_v35 = vmul.f32 %v2792_v30, %v3475_v0  ;;  %2813 = vtanh.f32 %v452_v42  ;;  %v463_v30 = vadd.f32 %v3645_v28, %v3511_v12 }
  0x90   : >> { %830 = vadd.xlane.f32.xlu0 %v692_v38  ;;  %v2796_v37 = vpop.eup %2795  ;;  %v704_v38 = vmul.f32 %v2794_v33, %v3475_v0  ;;  %2815 = vtanh.f32 %v455_v45  ;;  %v462_v33 = vadd.f32 %v3645_v28, %v3508_v11  ;;  %v466_v45 = vadd.f32 %v3645_v28, %v3520_v15 }
  0x91   : >> { %v2798_v39 = vpop.eup %2797 }
  0x92   : >> { %v2800_v43 = vpop.eup %2799  ;;  %v706_v62 = vmul.f32 %v2798_v39, %v3475_v0 }
  0x93   : >> { %836 = vadd.xlane.f32.xlu1 %v695_v41  ;;  %v707_v41 = vmul.f32 %v2796_v37, %v3475_v0  ;;  %v709_v46 = vmul.f32 %v2800_v43, %v3475_v0  ;;  %v465_v37 = vadd.f32 %v3645_v28, %v3517_v14 }
  0x94   : >> { %834 = vadd.xlane.f32.xlu0 %v694_v44  ;;  %v2802_v44 = vpop.eup %2801 }
  0x95   : >> { %v2804_v48 = vpop.eup %2803  ;;  %v708_v49 = vmul.f32 %v2802_v44, %v3475_v0 }
  0x96   : >> { %v711_v52 = vmul.f32 %v2804_v48, %v3475_v0 }
  0x97   : >> { %840 = vadd.xlane.f32.xlu1 %v697_v47  ;;  %v454_v47 = vadd.f32 %v3645_v28, %v3484_v3 }
  0x98   : >> { %838 = vadd.xlane.f32.xlu0 %v696_v50  ;;  %v2806_v50 = vpop.eup %2805 }
  0x99   : >> { %2817 = vtanh.f32 %v454_v47  ;;  %v2808_v54 = vpop.eup %2807  ;;  %v710_v56 = vmul.f32 %v2806_v50, %v3475_v0 }
  0x9a   : >> { %2819 = vtanh.f32 %v457_v51  ;;  %v713_v59 = vmul.f32 %v2808_v54, %v3475_v0 }
  0x9b   : >> { %844 = vadd.xlane.f32.xlu1 %v699_v53  ;;  %v456_v53 = vadd.f32 %v3645_v28, %v3490_v5 }
  0x9c   : >> { %842 = vadd.xlane.f32.xlu0 %v698_v57  ;;  %v2810_v57 = vpop.eup %2809 }
  0x9d   : >> { %2821 = vtanh.f32 %v456_v53  ;;  %v2812_v61 = vpop.eup %2811  ;;  %v712_v63 = vmul.f32 %v2810_v57, %v3475_v0 }
  0x9e   : >> { %2823 = vtanh.f32 %v459_v58  ;;  %v715_v21 = vmul.f32 %v2812_v61, %v3475_v0 }
  0x9f   : >> { %848 = vadd.xlane.f32.xlu1 %v701_v60  ;;  %v458_v60 = vadd.f32 %v3645_v28, %v3496_v7 }
  0xa0   : >> { %846 = vadd.xlane.f32.xlu0 %v700_v18  ;;  %v2814_v18 = vpop.eup %2813 }
  0xa1   : >> { %2825 = vtanh.f32 %v458_v60  ;;  %v2816_v24 = vpop.eup %2815 }
  0xa2   : >> { %2827 = vtanh.f32 %v461_v19 }
  0xa3   : >> { %852 = vadd.xlane.f32.xlu1 %v703_v31  ;;  %v714_v31 = vmul.f32 %v2814_v18, %v3475_v0  ;;  %v2818_v32 = vpop.eup %2817  ;;  %2829 = vtanh.f32 %v460_v22 }
  0xa4   : >> { %850 = vadd.xlane.f32.xlu0 %v702_v27  ;;  %v717_v27 = vmul.f32 %v2816_v24, %v3475_v0  ;;  %v2820_v34 = vpop.eup %2819  ;;  %2831 = vtanh.f32 %v463_v30 }
  0xa5   : >> { %v719_v39 = vmul.f32 %v2820_v34, %v3475_v0  ;;  %2833 = vtanh.f32 %v462_v33 }
  0xa6   : >> { %2835 = vtanh.f32 %v465_v37 }
  0xa7   : >> { %856 = vadd.xlane.f32.xlu1 %v705_v35  ;;  %v716_v35 = vmul.f32 %v2818_v32, %v3475_v0  ;;  %v2822_v36 = vpop.eup %2821  ;;  %2837 = vtanh.f32 %v464_v40 }
  0xa8   : >> { %854 = vadd.xlane.f32.xlu0 %v704_v38  ;;  %v378_v38 = vcombine.high %v3580_v55, %v3580_v55  ;;  %v718_v42 = vmul.f32 %v2822_v36, %v3475_v0 }
  0xaa   : >> { %v3698_v44 = vrot.slane %v378_v38, %v3548_v26 }
  0xab   : >> { %860 = vadd.xlane.f32.xlu1 %v707_v41  ;;  %v2824_v41 = vpop.eup %2823 }
  0xac   : >> { %858 = vadd.xlane.f32.xlu0 %v706_v62  ;;  %v2826_v43 = vpop.eup %2825  ;;  %v467_v62 = vadd.f32 %v3645_v28, %v3523_v16  ;;  %v721_v55 = vmul.f32 %v2824_v41, %v3475_v0  ;;  %v468_v51 = vadd.f32 %v3698_v44, %v3478_v1  ;;  %v471_v54 = vadd.f32 %v3698_v44, %v3487_v4 }
  0xad   : >> { %v720_v47 = vmul.f32 %v2826_v43, %v3475_v0  ;;  %v470_v57 = vadd.f32 %v3698_v44, %v3484_v3  ;;  %v473_v61 = vadd.f32 %v3698_v44, %v3493_v6  ;;  %v472_v18 = vadd.f32 %v3698_v44, %v3490_v5 }
  0xae   : >> { %2839 = vtanh.f32 %v467_v62  ;;  %v475_v24 = vadd.f32 %v3698_v44, %v3499_v8  ;;  %v474_v32 = vadd.f32 %v3698_v44, %v3496_v7  ;;  %v477_v34 = vadd.f32 %v3698_v44, %v3505_v10 }
  0xaf   : >> { %864 = vadd.xlane.f32.xlu1 %v709_v46  ;;  %v2828_v46 = vpop.eup %2827  ;;  %2841 = vtanh.f32 %v466_v45  ;;  %v476_v36 = vadd.f32 %v3698_v44, %v3502_v9  ;;  %v479_v40 = vadd.f32 %v3698_v44, %v3511_v12  ;;  %v481_v45 = vadd.f32 %v3698_v44, %v3517_v14 }
  0xb0   : >> { %862 = vadd.xlane.f32.xlu0 %v708_v49  ;;  %v2830_v48 = vpop.eup %2829  ;;  %v469_v49 = vadd.f32 %v3698_v44, %v3481_v2  ;;  %v723_v50 = vmul.f32 %v2828_v46, %v3475_v0 }
  0xb1   : >> { %v722_v28 = vmul.f32 %v2830_v48, %v3475_v0 }
  0xb2   : >> { %2843 = vtanh.f32 %v469_v49 }
  0xb3   : >> { %868 = vadd.xlane.f32.xlu1 %v711_v52  ;;  %v2832_v52 = vpop.eup %2831  ;;  %2845 = vtanh.f32 %v468_v51  ;;  %v483_v51 = vadd.f32 %v3698_v44, %v3523_v16 }
  0xb4   : >> { %866 = vadd.xlane.f32.xlu0 %v710_v56  ;;  %v2834_v53 = vpop.eup %2833  ;;  %v725_v56 = vmul.f32 %v2832_v52, %v3475_v0  ;;  %2847 = vtanh.f32 %v471_v54  ;;  %v3750_v52 = vrot.slane %v3558_v29, %v3548_v26 }
  0xb5   : >> { %v2836_v58 = vpop.eup %2835  ;;  %2849 = vtanh.f32 %v470_v57 }
  0xb6   : >> { %v2838_v60 = vpop.eup %2837  ;;  %2851 = vtanh.f32 %v473_v61 }
  0xb7   : >> { %872 = vadd.xlane.f32.xlu1 %v713_v59  ;;  %v724_v59 = vmul.f32 %v2834_v53, %v3475_v0  ;;  %2853 = vtanh.f32 %v472_v18  ;;  %v482_v53 = vadd.f32 %v3698_v44, %v3520_v15  ;;  %v487_v18 = vadd.f32 %v3750_v52, %v3487_v4 }
  0xb8   : >> { %870 = vadd.xlane.f32.xlu0 %v712_v63  ;;  %v727_v63 = vmul.f32 %v2836_v58, %v3475_v0  ;;  %v2840_v19 = vpop.eup %2839  ;;  %2855 = vtanh.f32 %v475_v24  ;;  %v485_v58 = vadd.f32 %v3750_v52, %v3481_v2 }
  0xb9   : >> { %v2842_v22 = vpop.eup %2841  ;;  %2857 = vtanh.f32 %v474_v32  ;;  %v489_v32 = vadd.f32 %v3750_v52, %v3493_v6 }
  0xba   : >> { %2859 = vtanh.f32 %v477_v34 }
  0xbb   : >> { %876 = vadd.xlane.f32.xlu1 %v715_v21  ;;  %v726_v21 = vmul.f32 %v2838_v60, %v3475_v0  ;;  %2861 = vtanh.f32 %v476_v36  ;;  %v484_v60 = vadd.f32 %v3750_v52, %v3478_v1  ;;  %v491_v36 = vadd.f32 %v3750_v52, %v3499_v8 }
  0xbc   : >> { %874 = vadd.xlane.f32.xlu0 %v714_v31  ;;  %v729_v31 = vmul.f32 %v2840_v19, %v3475_v0  ;;  %v2844_v30 = vpop.eup %2843  ;;  %2863 = vtanh.f32 %v479_v40 }
  0xbd   : >> { %v2846_v33 = vpop.eup %2845 }
  0xbe   : >> { %v2848_v37 = vpop.eup %2847  ;;  %v730_v38 = vmul.f32 %v2846_v33, %v3475_v0 }
  0xbf   : >> { %880 = vadd.xlane.f32.xlu1 %v717_v27  ;;  %v728_v27 = vmul.f32 %v2842_v22, %v3475_v0  ;;  %v733_v41 = vmul.f32 %v2848_v37, %v3475_v0 }
  0xc0   : >> { %878 = vadd.xlane.f32.xlu0 %v716_v35  ;;  %v731_v35 = vmul.f32 %v2844_v30, %v3475_v0 }
  0xc3   : >> { %884 = vadd.xlane.f32.xlu1 %v719_v39  ;;  %v2850_v39 = vpop.eup %2849 }
  0xc4   : >> { %882 = vadd.xlane.f32.xlu0 %v718_v42  ;;  %v478_v42 = vadd.f32 %v3698_v44, %v3508_v11  ;;  %v2852_v43 = vpop.eup %2851  ;;  %v732_v62 = vmul.f32 %v2850_v39, %v3475_v0 }
  0xc5   : >> { %v735_v46 = vmul.f32 %v2852_v43, %v3475_v0 }
  0xc6   : >> { %2865 = vtanh.f32 %v478_v42  ;;  %v493_v42 = vadd.f32 %v3750_v52, %v3505_v10 }
  0xc7   : >> { %888 = vadd.xlane.f32.xlu1 %v721_v55  ;;  %v2854_v55 = vpop.eup %2853  ;;  %2867 = vtanh.f32 %v481_v45 }
  0xc8   : >> { %886 = vadd.xlane.f32.xlu0 %v720_v47  ;;  %v480_v47 = vadd.f32 %v3698_v44, %v3514_v13  ;;  %v2856_v48 = vpop.eup %2855  ;;  %v734_v49 = vmul.f32 %v2854_v55, %v3475_v0 }
  0xca   : >> { %2869 = vtanh.f32 %v480_v47  ;;  %v495_v47 = vadd.f32 %v3750_v52, %v3511_v12 }
  0xcb   : >> { %892 = vadd.xlane.f32.xlu1 %v723_v50  ;;  %v2858_v50 = vpop.eup %2857  ;;  %2871 = vtanh.f32 %v483_v51 }
  0xcc   : >> { %890 = vadd.xlane.f32.xlu0 %v722_v28  ;;  %v737_v28 = vmul.f32 %v2856_v48, %v3475_v0  ;;  %v2860_v54 = vpop.eup %2859  ;;  %2873 = vtanh.f32 %v482_v53  ;;  %v3793_v53 = vand.u32 127, %v335_v17  ;;  %v499_v17 = vadd.f32 %v3750_v52, %v3523_v16 }
  0xcd   : >> { %v2862_v57 = vpop.eup %2861  ;;  %2875 = vtanh.f32 %v485_v58 }
  0xce   : >> { %v2864_v61 = vpop.eup %2863  ;;  %v738_v44 = vmul.f32 %v2862_v57, %v3475_v0  ;;  %2877 = vtanh.f32 %v484_v60  ;;  %v496_v57 = vadd.f32 %v3750_v52, %v3514_v13 }
  0xcf   : >> { %896 = vadd.xlane.f32.xlu1 %v725_v56  ;;  %v736_v56 = vmul.f32 %v2858_v50, %v3475_v0  ;;  %v741_v19 = vmul.f32 %v2864_v61, %v3475_v0  ;;  %2879 = vtanh.f32 %v487_v18  ;;  %v1207_v61 = vadd.s32 4294967280, %v3793_v53 }
  0xd0   : >> { %894 = vadd.xlane.f32.xlu0 %v724_v59  ;;  %v739_v59 = vmul.f32 %v2860_v54, %v3475_v0  ;;  %v497_v54 = vadd.f32 %v3750_v52, %v3517_v14 }
  0xd3   : >> { %900 = vadd.xlane.f32.xlu1 %v727_v63  ;;  %v2866_v63 = vpop.eup %2865 }
  0xd4   : >> { %898 = vadd.xlane.f32.xlu0 %v726_v21  ;;  %v486_v21 = vadd.f32 %v3750_v52, %v3484_v3  ;;  %v2868_v22 = vpop.eup %2867  ;;  %v740_v24 = vmul.f32 %v2866_v63, %v3475_v0  ;;  %v377_v63 = vcombine.high %v3558_v29, %v3558_v29  ;;  %v3821_v29 = vsub.s32 %v3793_v53, %v3538_v20 }
  0xd5   : >> { %v743_v30 = vmul.f32 %v2868_v22, %v3475_v0 }
  0xd6   : >> { %2881 = vtanh.f32 %v486_v21 }
  0xd7   : >> { %904 = vadd.xlane.f32.xlu1 %v729_v31  ;;  %v2870_v31 = vpop.eup %2869  ;;  %2883 = vtanh.f32 %v489_v32  ;;  %v1214_v32 = vadd.s32 4294967272, %v3793_v53 }
  0xd8   : >> { %902 = vadd.xlane.f32.xlu0 %v728_v27  ;;  %v488_v27 = vadd.f32 %v3750_v52, %v3490_v5  ;;  %v2872_v33 = vpop.eup %2871  ;;  %v742_v34 = vmul.f32 %v2870_v31, %v3475_v0  ;;  %v3815_v31 = vsub.s32 %v1207_v61, %v3538_v20 }
  0xd9   : >> { %v745_v37 = vmul.f32 %v2872_v33, %v3475_v0 }
  0xda   : >> { %2885 = vtanh.f32 %v488_v27  ;;  %v3826_v27 = vrot.slane %v377_v63, %v3548_v26 }
  0xdb   : >> { %908 = vadd.xlane.f32.xlu1 %v731_v35  ;;  %v2874_v35 = vpop.eup %2873  ;;  %2887 = vtanh.f32 %v491_v36 }
  0xdc   : >> { %906 = vadd.xlane.f32.xlu0 %v730_v38  ;;  %v490_v38 = vadd.f32 %v3750_v52, %v3496_v7  ;;  %v2876_v39 = vpop.eup %2875  ;;  %v744_v40 = vmul.f32 %v2874_v35, %v3475_v0 }
  0xdd   : >> { %v747_v43 = vmul.f32 %v2876_v39, %v3475_v0 }
  0xde   : >> { %2889 = vtanh.f32 %v490_v38  ;;  %v1228_v38 = vadd.s32 4294967256, %v3793_v53 }
  0xdf   : >> { %912 = vadd.xlane.f32.xlu1 %v733_v41  ;;  %v2878_v41 = vpop.eup %2877  ;;  %2891 = vtanh.f32 %v493_v42  ;;  %v3835_v42 = vsub.s32 %v1214_v32, %v3538_v20 }
  0xe0   : >> { %910 = vadd.xlane.f32.xlu0 %v732_v62  ;;  %v492_v62 = vadd.f32 %v3750_v52, %v3502_v9  ;;  %v2880_v55 = vpop.eup %2879  ;;  %v746_v45 = vmul.f32 %v2878_v41, %v3475_v0 }
  0xe1   : >> { %v749_v48 = vmul.f32 %v2880_v55, %v3475_v0 }
  0xe2   : >> { %2893 = vtanh.f32 %v492_v62  ;;  %v1221_v62 = vadd.s32 4294967264, %v3793_v53 }
  0xe3   : >> { %916 = vadd.xlane.f32.xlu1 %v735_v46  ;;  %v2882_v46 = vpop.eup %2881  ;;  %2895 = vtanh.f32 %v495_v47 }
  0xe4   : >> { %914 = vadd.xlane.f32.xlu0 %v734_v49  ;;  %v494_v49 = vadd.f32 %v3750_v52, %v3508_v11  ;;  %v2884_v50 = vpop.eup %2883  ;;  %v748_v51 = vmul.f32 %v2882_v46, %v3475_v0  ;;  %v379_v46 = vcombine.high %v3636_v25, %v3636_v25 }
  0xe6   : >> { %2897 = vtanh.f32 %v494_v49 }
  0xe7   : >> { %920 = vadd.xlane.f32.xlu1 %v737_v28  ;;  %v2886_v28 = vpop.eup %2885  ;;  %2899 = vtanh.f32 %v497_v54  ;;  %v1242_v54 = vadd.s32 4294967240, %v3793_v53 }
  0xe8   : >> { %918 = vadd.xlane.f32.xlu0 %v736_v56  ;;  %v751_v56 = vmul.f32 %v2884_v50, %v3475_v0  ;;  %v2888_v58 = vpop.eup %2887  ;;  %2901 = vtanh.f32 %v496_v57 }
  0xe9   : >> { %v2890_v60 = vpop.eup %2889  ;;  %v753_v18 = vmul.f32 %v2888_v58, %v3475_v0  ;;  %2903 = vtanh.f32 %v499_v17  ;;  %v3856_v58 = vsub.s32 %v1221_v62, %v3538_v20  ;;  %v3863_v17 = vrot.slane %v379_v46, %v3548_v26 }
  0xea   : >> { %v2892_v21 = vpop.eup %2891  ;;  %v752_v22 = vmul.f32 %v2890_v60, %v3475_v0  ;;  %v3871_v32 = vsub.s32 %v1242_v54, %v3538_v20  ;;  %v518_v62 = vadd.f32 %v3826_v27, %v3484_v3 }
  0xeb   : >> { %924 = vadd.xlane.f32.xlu1 %v739_v59  ;;  %v750_v59 = vmul.f32 %v2886_v28, %v3475_v0  ;;  %v755_v33 = vmul.f32 %v2892_v21, %v3475_v0  ;;  %v3851_v28 = vsub.s32 %v1228_v38, %v3538_v20 }
  0xec   : >> { %922 = vadd.xlane.f32.xlu0 %v738_v44  ;;  %v3806_v44 = vrot.slane %v3636_v25, %v3548_v26 }
  0xee   : >> { %v503_v61 = vadd.f32 %v3806_v44, %v3487_v4 }
  0xef   : >> { %928 = vadd.xlane.f32.xlu1 %v741_v19  ;;  %v498_v19 = vadd.f32 %v3750_v52, %v3520_v15  ;;  %v501_v52 = vadd.f32 %v3806_v44, %v3481_v2 }
  0xf0   : >> { %926 = vadd.xlane.f32.xlu0 %v740_v24  ;;  %v2894_v24 = vpop.eup %2893 }
  0xf1   : >> { %2905 = vtanh.f32 %v498_v19  ;;  %v2896_v35 = vpop.eup %2895 }
  0xf2   : >> { %v2898_v39 = vpop.eup %2897  ;;  %2907 = vtanh.f32 %v501_v52  ;;  %v757_v47 = vmul.f32 %v2896_v35, %v3475_v0 }
  0xf3   : >> { %932 = vadd.xlane.f32.xlu1 %v743_v30  ;;  %v1200_v30 = vadd.s32 4294967288, %v3793_v53  ;;  %v2900_v49 = vpop.eup %2899 }
  0xf4   : >> { %930 = vadd.xlane.f32.xlu0 %v742_v34  ;;  %v500_v34 = vadd.f32 %v3806_v44, %v3478_v1  ;;  %v2902_v25 = vpop.eup %2901  ;;  %v759_v63 = vmul.f32 %v2900_v49, %v3475_v0 }
  0xf5   : >> { %v2904_v19 = vpop.eup %2903 }
  0xf6   : >> { %2909 = vtanh.f32 %v500_v34 }
  0xf7   : >> { %936 = vadd.xlane.f32.xlu1 %v745_v37  ;;  %v754_v37 = vmul.f32 %v2894_v24, %v3475_v0  ;;  %v758_v24 = vmul.f32 %v2902_v25, %v3475_v0 }
  0xf8   : >> { %934 = vadd.xlane.f32.xlu0 %v744_v40 }
  0xfb   : >> { %940 = vadd.xlane.f32.xlu1 %v747_v43  ;;  %v3838_v43 = vsub.s32 %v1200_v30, %v3538_v20  ;;  %v1256_v30 = vadd.s32 4294967224, %v3793_v53  ;;  %v2906_v52 = vpop.eup %2905 }
  0xfc   : >> { %938 = vadd.xlane.f32.xlu0 %v746_v45  ;;  %v516_v45 = vadd.f32 %v3826_v27, %v3478_v1 }
  0xfe   : >> { %2911 = vtanh.f32 %v516_v45 }
  0xff   : >> { %944 = vadd.xlane.f32.xlu1 %v749_v48  ;;  %v502_v48 = vadd.f32 %v3806_v44, %v3484_v3 }
 0x100   : >> { %942 = vadd.xlane.f32.xlu0 %v748_v51  ;;  %v756_v51 = vmul.f32 %v2898_v39, %v3475_v0 }
 0x101   : >> { %2913 = vtanh.f32 %v502_v48  ;;  %v3890_v48 = vsub.s32 %v1256_v30, %v3538_v20 }
 0x102   : >> { %2915 = vtanh.f32 %v503_v61 }
 0x103   : >> { %948 = vadd.xlane.f32.xlu1 %v751_v56 }
 0x104   : >> { %946 = vadd.xlane.f32.xlu0 %v750_v59  ;;  %v1235_v59 = vadd.s32 4294967248, %v3793_v53 }
 0x107   : >> { %952 = vadd.xlane.f32.xlu1 %v753_v18  ;;  %v517_v18 = vadd.f32 %v3826_v27, %v3481_v2 }
 0x108   : >> { %950 = vadd.xlane.f32.xlu0 %v752_v22  ;;  %v815_v36 = vpop.xlane.xlu1 %814 }
 0x109   : >> { %v1211_v40 = vrot.slane %v815_v36, %v3815_v31  ;;  %v811_v41 = vpop.xlane.xlu0 %810  ;;  %v3877_v36 = vsub.s32 %v1235_v59, %v3538_v20  ;;  %2917 = vtanh.f32 %v517_v18  ;;  %v1263_v59 = vadd.s32 4294967216, %v3793_v53 }
 0x10a   : >> { %v1199_v55 = vrot.slane %v811_v41, %v3821_v29  ;;  %v532_v41 = vadd.f32 %v3863_v17, %v3478_v1 }
 0x10b   : >> { %956 = vadd.xlane.f32.xlu1 %v755_v33 }
 0x10c   : >> { %954 = vadd.xlane.f32.xlu0 %v754_v37  ;;  %v817_v50 = vpop.xlane.xlu1 %816  ;;  %v1249_v37 = vadd.s32 4294967232, %v3793_v53  ;;  %2919 = vtanh.f32 %v532_v41  ;;  %v534_v41 = vadd.f32 %v3863_v17, %v3484_v3 }
 0x10d   : >> { %v1218_v56 = vrot.slane %v817_v50, %v3835_v42  ;;  %v813_v57 = vpop.xlane.xlu0 %812  ;;  %2921 = vtanh.f32 %v518_v62  ;;  %v519_v62 = vadd.f32 %v3826_v27, %v3487_v4 }
 0x10e   : >> { %v1204_v60 = vrot.slane %v813_v57, %v3838_v43  ;;  %v3895_v25 = vsub.s32 %v1249_v37, %v3538_v20  ;;  %v1277_v37 = vadd.s32 4294967200, %v3793_v53 }
 0x10f   : >> { %960 = vadd.xlane.f32.xlu1 %v757_v47  ;;  %v760_v47 = vmul.f32 %v2906_v52, %v3475_v0 }
 0x110   : >> { %v1206_v21 = vsel %vm1205_vm0, %v1204_v60, %v1199_v55  ;;  %958 = vadd.xlane.f32.xlu0 %v756_v51  ;;  %v821_v22 = vpop.xlane.xlu1 %820  ;;  %v2908_v55 = vpop.eup %2907  ;;  %v504_v60 = vadd.f32 %v3806_v44, %v3490_v5 }
 0x111   : >> { %v1213_v33 = vsel %vm1212_vm1, %v1211_v40, %v1206_v21  ;;  %v1232_v34 = vrot.slane %v821_v22, %v3851_v28  ;;  %v819_v35 = vpop.xlane.xlu0 %818  ;;  %v761_v40 = vmul.f32 %v2904_v19, %v3475_v0  ;;  %v2910_v49 = vpop.eup %2909  ;;  %v763_v61 = vmul.f32 %v2908_v55, %v3475_v0 }
 0x112   : >> { %v1220_v38 = vsel %vm1219_vm2, %v1218_v56, %v1213_v33  ;;  %v1225_v39 = vrot.slane %v819_v35, %v3856_v58  ;;  %v1270_v56 = vadd.s32 4294967208, %v3793_v53  ;;  %v2912_v18 = vpop.eup %2911  ;;  %v762_v22 = vmul.f32 %v2910_v49, %v3475_v0 }
 0x113   : >> { %964 = vadd.xlane.f32.xlu1 %v759_v63  ;;  %v533_v63 = vadd.f32 %v3863_v17, %v3481_v2  ;;  %v2914_v30 = vpop.eup %2913  ;;  %2923 = vtanh.f32 %v504_v60 }
 0x114   : >> { %v1227_v45 = vsel %vm1226_vm3, %v1225_v39, %v1220_v38  ;;  %962 = vadd.xlane.f32.xlu0 %v758_v24  ;;  %v825_v46 = vpop.xlane.xlu1 %824  ;;  %v1284_v24 = vadd.s32 4294967192, %v3793_v53  ;;  %v3911_v35 = vsub.s32 %v1270_v56, %v3538_v20  ;;  %v3916_v39 = vsub.s32 %v1263_v59, %v3538_v20  ;;  %v2916_v55 = vpop.eup %2915 }
 0x115   : >> { %v1246_v50 = vrot.slane %v825_v46, %v3871_v32  ;;  %v1234_v51 = vsel %vm1233_vm4, %v1232_v34, %v1227_v45  ;;  %v823_v54 = vpop.xlane.xlu0 %822  ;;  %2925 = vtanh.f32 %v533_v63  ;;  %v1298_v59 = vadd.s32 4294967176, %v3793_v53 }
 0x116   : >> { %v1239_v57 = vrot.slane %v823_v54, %v3877_v36  ;;  %v3926_v49 = vsub.s32 %v1284_v24, %v3538_v20  ;;  %2927 = vtanh.f32 %v534_v41  ;;  %v520_v63 = vadd.f32 %v3826_v27, %v3490_v5 }
 0x117   : >> { %968 = vadd.xlane.f32.xlu1 %v761_v40  ;;  %v778_v40 = vmul.f32 %v2912_v18, %v3475_v0  ;;  %v765_v18 = vmul.f32 %v2916_v55, %v3475_v0  ;;  %2929 = vtanh.f32 %v519_v62  ;;  %v506_v62 = vadd.f32 %v3806_v44, %v3496_v7 }
 0x118   : >> { %v1241_v19 = vsel %vm1240_vm5, %v1239_v57, %v1234_v51  ;;  %966 = vadd.xlane.f32.xlu0 %v760_v47  ;;  %v829_v21 = vpop.xlane.xlu1 %828  ;;  %v764_v47 = vmul.f32 %v2914_v30, %v3475_v0  ;;  %v3931_v57 = vsub.s32 %v1277_v37, %v3538_v20  ;;  %2931 = vtanh.f32 %v520_v63 }
 0x119   : >> { %v1260_v52 = vrot.slane %v829_v21, %v3890_v48  ;;  %v1248_v33 = vsel %vm1247_vm6, %v1246_v50, %v1241_v19  ;;  %v827_v34 = vpop.xlane.xlu0 %826  ;;  %v2918_v50 = vpop.eup %2917  ;;  %v505_v19 = vadd.f32 %v3806_v44, %v3493_v6 }
 0x11a   : >> { %v1253_v38 = vrot.slane %v827_v34, %v3895_v25  ;;  %v2920_v21 = vpop.eup %2919  ;;  %v779_v30 = vmul.f32 %v2918_v50, %v3475_v0 }
 0x11b   : >> { %972 = vadd.xlane.f32.xlu1 %v763_v61  ;;  %v1291_v61 = vadd.s32 4294967184, %v3793_v53  ;;  %v794_v55 = vmul.f32 %v2920_v21, %v3475_v0  ;;  %2933 = vtanh.f32 %v505_v19 }
 0x11c   : >> { %v1255_v45 = vsel %vm1254_vm7, %v1253_v38, %v1248_v33  ;;  %970 = vadd.xlane.f32.xlu0 %v762_v22  ;;  %v833_v46 = vpop.xlane.xlu1 %832  ;;  %v3946_v38 = vsub.s32 %v1298_v59, %v3538_v20  ;;  %2935 = vtanh.f32 %v506_v62 }
 0x11d   : >> { %v1274_v51 = vrot.slane %v833_v46, %v3911_v35  ;;  %v1262_v54 = vsel %vm1261_vm8, %v1260_v52, %v1255_v45  ;;  %v831_v56 = vpop.xlane.xlu0 %830  ;;  %v2922_v52 = vpop.eup %2921  ;;  %v535_v45 = vadd.f32 %v3863_v17, %v3487_v4 }
 0x11e   : >> { %v1267_v60 = vrot.slane %v831_v56, %v3916_v39  ;;  %v2924_v46 = vpop.eup %2923 }
 0x11f   : >> { %1002 = vadd.xlane.f32.xlu1 %v778_v40  ;;  %v3950_v40 = vsub.s32 %v1291_v61, %v3538_v20  ;;  %v2926_v20 = vpop.eup %2925  ;;  %v536_v61 = vadd.f32 %v3863_v17, %v3490_v5  ;;  %v766_v63 = vmul.f32 %v2924_v46, %v3475_v0  ;;  %2937 = vtanh.f32 %v535_v45 }
 0x120   : >> { %v1269_v22 = vsel %vm1268_vm9, %v1267_v60, %v1262_v54  ;;  %974 = vadd.xlane.f32.xlu0 %v764_v47  ;;  %v837_v24 = vpop.xlane.xlu1 %836  ;;  %v2928_v19 = vpop.eup %2927 }
 0x121   : >> { %v1288_v33 = vrot.slane %v837_v24, %v3926_v49  ;;  %v1276_v34 = vsel %vm1275_vm10, %v1274_v51, %v1269_v22  ;;  %v835_v37 = vpop.xlane.xlu0 %834  ;;  %v780_v51 = vmul.f32 %v2922_v52, %v3475_v0  ;;  %v795_v24 = vmul.f32 %v2926_v20, %v3475_v0 }
 0x122   : >> { %v1281_v41 = vrot.slane %v835_v37, %v3931_v57  ;;  %2939 = vtanh.f32 %v536_v61  ;;  %v796_v62 = vmul.f32 %v2928_v19, %v3475_v0  ;;  %v537_v61 = vadd.f32 %v3863_v17, %v3493_v6 }
 0x123   : >> { %976 = vadd.xlane.f32.xlu1 %v765_v18  ;;  %v521_v18 = vadd.f32 %v3826_v27, %v3493_v6 }
 0x124   : >> { %v1283_v47 = vsel %vm1282_vm11, %v1281_v41, %v1276_v34  ;;  %1004 = vadd.xlane.f32.xlu0 %v779_v30  ;;  %v841_v50 = vpop.xlane.xlu1 %840  ;;  %v2930_v30 = vpop.eup %2929  ;;  %v522_v41 = vadd.f32 %v3826_v27, %v3496_v7 }
 0x125   : >> { %v1302_v54 = vrot.slane %v841_v50, %v3946_v38  ;;  %v1290_v56 = vsel %vm1289_vm12, %v1288_v33, %v1283_v47  ;;  %v839_v59 = vpop.xlane.xlu0 %838  ;;  %2941 = vtanh.f32 %v521_v18  ;;  %v2932_v45 = vpop.eup %2931  ;;  %v781_v50 = vmul.f32 %v2930_v30, %v3475_v0 }
 0x126   : >> { %v1295_v60 = vrot.slane %v839_v59, %v3950_v40  ;;  %2943 = vtanh.f32 %v522_v41  ;;  %v508_v59 = vadd.f32 %v3806_v44, %v3502_v9 }
 0x127   : >> { %1034 = vadd.xlane.f32.xlu1 %v794_v55  ;;  %v507_v55 = vadd.f32 %v3806_v44, %v3499_v8 }
 0x128   : >> { %v1297_v21 = vsel %vm1296_vm13, %v1295_v60, %v1290_v56  ;;  %1006 = vadd.xlane.f32.xlu0 %v780_v51  ;;  %v845_v22 = vpop.xlane.xlu1 %844  ;;  %v2934_v51 = vpop.eup %2933  ;;  %v782_v60 = vmul.f32 %v2932_v45, %v3475_v0 }
 0x129   : >> { %v3970_v52 = vsel %vm1303_vm14, %v1302_v54, %v1297_v21  ;;  %v1312_v33 = vrot.slane %v845_v22, %v3838_v43  ;;  %v843_v34 = vpop.xlane.xlu0 %842  ;;  %2945 = vtanh.f32 %v507_v55  ;;  %v767_v21 = vmul.f32 %v2934_v51, %v3475_v0 }
 0x12a   : >> { %v1308_v37 = vrot.slane %v843_v34, %v3821_v29  ;;  %2947 = vtanh.f32 %v508_v59  ;;  %v524_v59 = vadd.f32 %v3826_v27, %v3502_v9 }
 0x12b   : >> { %978 = vadd.xlane.f32.xlu1 %v766_v63  ;;  %v2936_v63 = vpop.eup %2935  ;;  %2949 = vtanh.f32 %v537_v61  ;;  %v509_v61 = vadd.f32 %v3806_v44, %v3505_v10 }
 0x12c   : >> { %v1313_v46 = vsel %vm1205_vm0, %v1312_v33, %v1308_v37  ;;  %1036 = vadd.xlane.f32.xlu0 %v795_v24  ;;  %v849_v47 = vpop.xlane.xlu1 %848  ;;  %v2938_v22 = vpop.eup %2937  ;;  %v538_v37 = vadd.f32 %v3863_v17, %v3496_v7  ;;  %v768_v41 = vmul.f32 %v2936_v63, %v3475_v0 }
 0x12d   : >> { %v1322_v20 = vrot.slane %v849_v47, %v3835_v42  ;;  %v847_v54 = vpop.xlane.xlu0 %846  ;;  %v2940_v55 = vpop.eup %2939  ;;  %v797_v47 = vmul.f32 %v2938_v22, %v3475_v0 }
 0x12e   : >> { %v1317_v56 = vrot.slane %v847_v54, %v3815_v31  ;;  %2951 = vtanh.f32 %v538_v37  ;;  %v510_v37 = vadd.f32 %v3806_v44, %v3508_v11 }
 0x12f   : >> { %1038 = vadd.xlane.f32.xlu1 %v796_v62  ;;  %v523_v62 = vadd.f32 %v3826_v27, %v3499_v8 }
 0x130   : >> { %v1318_v18 = vsel %vm1212_vm1, %v1317_v56, %v1313_v46  ;;  %1008 = vadd.xlane.f32.xlu0 %v781_v50  ;;  %v853_v19 = vpop.xlane.xlu1 %852  ;;  %v2942_v50 = vpop.eup %2941 }
 0x131   : >> { %v1332_v24 = vrot.slane %v853_v19, %v3851_v28  ;;  %v1323_v30 = vsel %vm1219_vm2, %v1322_v20, %v1318_v18  ;;  %v851_v33 = vpop.xlane.xlu0 %850  ;;  %2953 = vtanh.f32 %v523_v62  ;;  %v2944_v63 = vpop.eup %2943  ;;  %v539_v62 = vadd.f32 %v3863_v17, %v3499_v8 }
 0x132   : >> { %v1327_v34 = vrot.slane %v851_v33, %v3856_v58  ;;  %2955 = vtanh.f32 %v524_v59  ;;  %v540_v59 = vadd.f32 %v3863_v17, %v3502_v9 }
 0x133   : >> { %1010 = vadd.xlane.f32.xlu1 %v782_v60  ;;  %v798_v60 = vmul.f32 %v2940_v55, %v3475_v0  ;;  %v2946_v22 = vpop.eup %2945  ;;  %2957 = vtanh.f32 %v509_v61  ;;  %v525_v61 = vadd.f32 %v3826_v27, %v3505_v10 }
 0x134   : >> { %v1328_v45 = vsel %vm1226_vm3, %v1327_v34, %v1323_v30  ;;  %980 = vadd.xlane.f32.xlu0 %v767_v21  ;;  %v857_v46 = vpop.xlane.xlu1 %856  ;;  %v783_v21 = vmul.f32 %v2942_v50, %v3475_v0  ;;  %v2948_v55 = vpop.eup %2947  ;;  %2959 = vtanh.f32 %v510_v37  ;;  %v526_v37 = vadd.f32 %v3826_v27, %v3508_v11 }
 0x135   : >> { %v1342_v51 = vrot.slane %v857_v46, %v3871_v32  ;;  %v1333_v20 = vsel %vm1233_vm4, %v1332_v24, %v1328_v45  ;;  %v855_v54 = vpop.xlane.xlu0 %854  ;;  %v2950_v50 = vpop.eup %2949  ;;  %2961 = vtanh.f32 %v539_v62  ;;  %v511_v62 = vadd.f32 %v3806_v44, %v3511_v12 }
 0x136   : >> { %v1337_v56 = vrot.slane %v855_v54, %v3877_v36  ;;  %2963 = vtanh.f32 %v540_v59  ;;  %v512_v59 = vadd.f32 %v3806_v44, %v3514_v13 }
 0x137   : >> { %982 = vadd.xlane.f32.xlu1 %v768_v41  ;;  %v784_v41 = vmul.f32 %v2944_v63, %v3475_v0  ;;  %2965 = vtanh.f32 %v525_v61  ;;  %v541_v61 = vadd.f32 %v3863_v17, %v3505_v10 }
 0x138   : >> { %v1338_v18 = vsel %vm1240_vm5, %v1337_v56, %v1333_v20  ;;  %1040 = vadd.xlane.f32.xlu0 %v797_v47  ;;  %v861_v19 = vpop.xlane.xlu1 %860  ;;  %v769_v47 = vmul.f32 %v2946_v22, %v3475_v0  ;;  %v2952_v63 = vpop.eup %2951  ;;  %2967 = vtanh.f32 %v526_v37 }
 0x139   : >> { %v1352_v24 = vrot.slane %v861_v19, %v3890_v48  ;;  %v1343_v30 = vsel %vm1247_vm6, %v1342_v51, %v1338_v18  ;;  %v859_v33 = vpop.xlane.xlu0 %858  ;;  %2969 = vtanh.f32 %v511_v62 }
 0x13a   : >> { %v1347_v34 = vrot.slane %v859_v33, %v3895_v25  ;;  %2971 = vtanh.f32 %v512_v59 }
 0x13b   : >> { %1042 = vadd.xlane.f32.xlu1 %v798_v60  ;;  %v770_v60 = vmul.f32 %v2948_v55, %v3475_v0  ;;  %v2954_v22 = vpop.eup %2953  ;;  %2973 = vtanh.f32 %v541_v61 }
 0x13c   : >> { %v1348_v45 = vsel %vm1254_vm7, %v1347_v34, %v1343_v30  ;;  %1012 = vadd.xlane.f32.xlu0 %v783_v21  ;;  %v865_v46 = vpop.xlane.xlu1 %864  ;;  %v799_v21 = vmul.f32 %v2950_v50, %v3475_v0  ;;  %v2956_v55 = vpop.eup %2955 }
 0x13d   : >> { %v1362_v51 = vrot.slane %v865_v46, %v3911_v35  ;;  %v1353_v20 = vsel %vm1261_vm8, %v1352_v24, %v1348_v45  ;;  %v863_v54 = vpop.xlane.xlu0 %862  ;;  %v2958_v50 = vpop.eup %2957 }
 0x13e   : >> { %v1357_v56 = vrot.slane %v863_v54, %v3916_v39 }
 0x13f   : >> { %1014 = vadd.xlane.f32.xlu1 %v784_v41  ;;  %v800_v41 = vmul.f32 %v2952_v63, %v3475_v0  ;;  %v2960_v63 = vpop.eup %2959 }
 0x140   : >> { %v1358_v18 = vsel %vm1268_vm9, %v1357_v56, %v1353_v20  ;;  %984 = vadd.xlane.f32.xlu0 %v769_v47  ;;  %v869_v19 = vpop.xlane.xlu1 %868  ;;  %v785_v47 = vmul.f32 %v2954_v22, %v3475_v0  ;;  %v2962_v22 = vpop.eup %2961  ;;  %v772_v62 = vmul.f32 %v2960_v63, %v3475_v0 }
 0x141   : >> { %v1372_v24 = vrot.slane %v869_v19, %v3926_v49  ;;  %v1363_v30 = vsel %vm1275_vm10, %v1362_v51, %v1358_v18  ;;  %v867_v33 = vpop.xlane.xlu0 %866 }
 0x142   : >> { %v1367_v34 = vrot.slane %v867_v33, %v3931_v57 }
 0x143   : >> { %986 = vadd.xlane.f32.xlu1 %v770_v60  ;;  %v786_v60 = vmul.f32 %v2956_v55, %v3475_v0  ;;  %v527_v55 = vadd.f32 %v3826_v27, %v3511_v12 }
 0x144   : >> { %v1368_v45 = vsel %vm1282_vm11, %v1367_v34, %v1363_v30  ;;  %1044 = vadd.xlane.f32.xlu0 %v799_v21  ;;  %v873_v46 = vpop.xlane.xlu1 %872  ;;  %v771_v21 = vmul.f32 %v2958_v50, %v3475_v0 }
 0x145   : >> { %v1382_v51 = vrot.slane %v873_v46, %v3946_v38  ;;  %v1373_v20 = vsel %vm1289_vm12, %v1372_v24, %v1368_v45  ;;  %v871_v54 = vpop.xlane.xlu0 %870  ;;  %v2964_v45 = vpop.eup %2963 }
 0x146   : >> { %v1377_v56 = vrot.slane %v871_v54, %v3950_v40  ;;  %v2966_v50 = vpop.eup %2965  ;;  %v802_v59 = vmul.f32 %v2964_v45, %v3475_v0 }
 0x147   : >> { %1046 = vadd.xlane.f32.xlu1 %v800_v41  ;;  %v542_v41 = vadd.f32 %v3863_v17, %v3508_v11  ;;  %v2968_v61 = vpop.eup %2967 }
 0x148   : >> { %v1378_v18 = vsel %vm1296_vm13, %v1377_v56, %v1373_v20  ;;  %1016 = vadd.xlane.f32.xlu0 %v785_v47  ;;  %v877_v19 = vpop.xlane.xlu1 %876  ;;  %v528_v56 = vadd.f32 %v3826_v27, %v3514_v13 }
 0x149   : >> { %v1383_v24 = vsel %vm1303_vm14, %v1382_v51, %v1378_v18  ;;  %v1391_v30 = vrot.slane %v877_v19, %v3838_v43  ;;  %v875_v33 = vpop.xlane.xlu0 %874  ;;  %2975 = vtanh.f32 %v542_v41  ;;  %v787_v19 = vmul.f32 %v2966_v50, %v3475_v0 }
 0x14a   : >> { %v4054_v34 = vsel %vm4569_vm15, %v1383_v24, %v3970_v52  ;;  %v1387_v37 = vrot.slane %v875_v33, %v3821_v29  ;;  %v801_v52 = vmul.f32 %v2962_v22, %v3475_v0  ;;  %2977 = vtanh.f32 %v527_v55 }
 0x14b   : >> { %1018 = vadd.xlane.f32.xlu1 %v786_v60  ;;  %v513_v60 = vadd.f32 %v3806_v44, %v3517_v14  ;;  %2979 = vtanh.f32 %v528_v56  ;;  %v788_v41 = vmul.f32 %v2968_v61, %v3475_v0  ;;  %v544_v56 = vadd.f32 %v3863_v17, %v3514_v13 }
 0x14c   : >> { %v1392_v46 = vsel %vm1205_vm0, %v1391_v30, %v1387_v37  ;;  %988 = vadd.xlane.f32.xlu0 %v771_v21  ;;  %v881_v47 = vpop.xlane.xlu1 %880  ;;  %v2970_v21 = vpop.eup %2969  ;;  %v514_v37 = vadd.f32 %v3806_v44, %v3520_v15  ;;  %vm4570_vm15 = vcmask 1042434  }
 0x14d   : >> { %v1401_v51 = vrot.slane %v881_v47, %v3835_v42  ;;  %v879_v20 = vpop.xlane.xlu0 %878  ;;  %2981 = vtanh.f32 %v513_v60  ;;  %v2972_v55 = vpop.eup %2971  ;;  %v773_v47 = vmul.f32 %v2970_v21, %v3475_v0  ;;  %v529_v60 = vadd.f32 %v3826_v27, %v3517_v14 }
 0x14e   : >> { %v1396_v54 = vrot.slane %v879_v20, %v3815_v31  ;;  %2983 = vtanh.f32 %v514_v37  ;;  %v530_v37 = vadd.f32 %v3826_v27, %v3520_v15 }
 0x14f   : >> { %990 = vadd.xlane.f32.xlu1 %v772_v62  ;;  %v543_v62 = vadd.f32 %v3863_v17, %v3511_v12 }
 0x150   : >> { %v1397_v63 = vsel %vm1212_vm1, %v1396_v54, %v1392_v46  ;;  %1048 = vadd.xlane.f32.xlu0 %v801_v52  ;;  %v885_v18 = vpop.xlane.xlu1 %884  ;;  %v2974_v52 = vpop.eup %2973 }
 0x151   : >> { %v1411_v22 = vrot.slane %v885_v18, %v3851_v28  ;;  %v1402_v24 = vsel %vm1219_vm2, %v1401_v51, %v1397_v63  ;;  %v883_v30 = vpop.xlane.xlu0 %882  ;;  %2985 = vtanh.f32 %v543_v62  ;;  %v515_v62 = vadd.f32 %v3806_v44, %v3523_v16 }
 0x152   : >> { %v1406_v33 = vrot.slane %v883_v30, %v3856_v58  ;;  %2987 = vtanh.f32 %v544_v56  ;;  %v531_v56 = vadd.f32 %v3826_v27, %v3523_v16 }
 0x153   : >> { %1050 = vadd.xlane.f32.xlu1 %v802_v59  ;;  %v774_v59 = vmul.f32 %v2972_v55, %v3475_v0  ;;  %v2976_v61 = vpop.eup %2975  ;;  %2989 = vtanh.f32 %v529_v60 }
 0x154   : >> { %v1407_v45 = vsel %vm1226_vm3, %v1406_v33, %v1402_v24  ;;  %1020 = vadd.xlane.f32.xlu0 %v787_v19  ;;  %v889_v46 = vpop.xlane.xlu1 %888  ;;  %v803_v19 = vmul.f32 %v2974_v52, %v3475_v0  ;;  %v2978_v21 = vpop.eup %2977  ;;  %2991 = vtanh.f32 %v530_v37  ;;  %v546_v37 = vadd.f32 %v3863_v17, %v3520_v15 }
 0x155   : >> { %v1421_v50 = vrot.slane %v889_v46, %v3871_v32  ;;  %v1412_v51 = vsel %vm1233_vm4, %v1411_v22, %v1407_v45  ;;  %v887_v20 = vpop.xlane.xlu0 %886  ;;  %v2980_v55 = vpop.eup %2979  ;;  %2993 = vtanh.f32 %v515_v62 }
 0x156   : >> { %v1416_v54 = vrot.slane %v887_v20, %v3877_v36  ;;  %v790_v44 = vmul.f32 %v2980_v55, %v3475_v0  ;;  %2995 = vtanh.f32 %v531_v56 }
 0x157   : >> { %1022 = vadd.xlane.f32.xlu1 %v788_v41  ;;  %v804_v41 = vmul.f32 %v2976_v61, %v3475_v0  ;;  %v2982_v52 = vpop.eup %2981 }
 0x158   : >> { %v1417_v63 = vsel %vm1240_vm5, %v1416_v54, %v1412_v51  ;;  %992 = vadd.xlane.f32.xlu0 %v773_v47  ;;  %v893_v18 = vpop.xlane.xlu1 %892  ;;  %v789_v47 = vmul.f32 %v2978_v21, %v3475_v0  ;;  %v2984_v60 = vpop.eup %2983 }
 0x159   : >> { %v1431_v22 = vrot.slane %v893_v18, %v3890_v48  ;;  %v1422_v24 = vsel %vm1247_vm6, %v1421_v50, %v1417_v63  ;;  %v891_v30 = vpop.xlane.xlu0 %890  ;;  %v775_v18 = vmul.f32 %v2982_v52, %v3475_v0 }
 0x15a   : >> { %v1426_v33 = vrot.slane %v891_v30, %v3895_v25  ;;  %v547_v30 = vadd.f32 %v3863_v17, %v3523_v16 }
 0x15b   : >> { %994 = vadd.xlane.f32.xlu1 %v774_v59  ;;  %v545_v59 = vadd.f32 %v3863_v17, %v3517_v14 }
 0x15c   : >> { %v1427_v45 = vsel %vm1254_vm7, %v1426_v33, %v1422_v24  ;;  %1052 = vadd.xlane.f32.xlu0 %v803_v19  ;;  %v897_v46 = vpop.xlane.xlu1 %896  ;;  %v2986_v19 = vpop.eup %2985  ;;  %v776_v33 = vmul.f32 %v2984_v60, %v3475_v0 }
 0x15d   : >> { %v1441_v50 = vrot.slane %v897_v46, %v3911_v35  ;;  %v1432_v51 = vsel %vm1261_vm8, %v1431_v22, %v1427_v45  ;;  %v895_v20 = vpop.xlane.xlu0 %894  ;;  %2997 = vtanh.f32 %v545_v59  ;;  %v805_v45 = vmul.f32 %v2986_v19, %v3475_v0 }
 0x15e   : >> { %v1436_v54 = vrot.slane %v895_v20, %v3916_v39  ;;  %2999 = vtanh.f32 %v547_v30 }
 0x15f   : >> { %1054 = vadd.xlane.f32.xlu1 %v804_v41  ;;  %v2988_v41 = vpop.eup %2987  ;;  %3001 = vtanh.f32 %v546_v37 }
 0x160   : >> { %v1437_v61 = vsel %vm1268_vm9, %v1436_v54, %v1432_v51  ;;  %1024 = vadd.xlane.f32.xlu0 %v789_v47  ;;  %v901_v63 = vpop.xlane.xlu1 %900  ;;  %v2990_v46 = vpop.eup %2989  ;;  %v806_v17 = vmul.f32 %v2988_v41, %v3475_v0 }
 0x161   : >> { %v1451_v21 = vrot.slane %v901_v63, %v3926_v49  ;;  %v1442_v22 = vsel %vm1275_vm10, %v1441_v50, %v1437_v61  ;;  %v899_v27 = vpop.xlane.xlu0 %898  ;;  %v2992_v20 = vpop.eup %2991 }
 0x162   : >> { %v1446_v24 = vrot.slane %v899_v27, %v3931_v57  ;;  %v2994_v59 = vpop.eup %2993 }
 0x163   : >> { %1026 = vadd.xlane.f32.xlu1 %v790_v44  ;;  %v791_v44 = vmul.f32 %v2990_v46, %v3475_v0  ;;  %v777_v30 = vmul.f32 %v2994_v59, %v3475_v0 }
 0x164   : >> { %v1447_v62 = vsel %vm1282_vm11, %v1446_v24, %v1442_v22  ;;  %996 = vadd.xlane.f32.xlu0 %v775_v18  ;;  %v905_v55 = vpop.xlane.xlu1 %904  ;;  %v2996_v22 = vpop.eup %2995 }
 0x165   : >> { %v1461_v47 = vrot.slane %v905_v55, %v3946_v38  ;;  %v1452_v52 = vsel %vm1289_vm12, %v1451_v21, %v1447_v62  ;;  %v903_v50 = vpop.xlane.xlu0 %902  ;;  %v792_v21 = vmul.f32 %v2992_v20, %v3475_v0 }
 0x166   : >> { %v1456_v51 = vrot.slane %v903_v50, %v3950_v40 }
 0x167   : >> { %998 = vadd.xlane.f32.xlu1 %v776_v33  ;;  %v2998_v33 = vpop.eup %2997 }
 0x168   : >> { %v1457_v54 = vsel %vm1296_vm13, %v1456_v51, %v1452_v52  ;;  %1056 = vadd.xlane.f32.xlu0 %v805_v45  ;;  %v909_v56 = vpop.xlane.xlu1 %908  ;;  %v3000_v55 = vpop.eup %2999 }
 0x169   : >> { %v1462_v60 = vsel %vm1303_vm14, %v1461_v47, %v1457_v54  ;;  %v1470_v61 = vrot.slane %v909_v56, %v3838_v43  ;;  %v907_v63 = vpop.xlane.xlu0 %906  ;;  %v807_v47 = vmul.f32 %v2998_v33, %v3475_v0  ;;  %v3002_v52 = vpop.eup %3001  ;;  %v809_v54 = vmul.f32 %v3000_v55, %v3475_v0 }
 0x16a   : >> { %v4133_v18 = vsel %vm4570_vm15, %v1462_v60, %v4054_v34  ;;  %v1466_v19 = vrot.slane %v907_v63, %v3821_v29  ;;  %v793_v34 = vmul.f32 %v2996_v22, %v3475_v0  ;;  %v808_v59 = vmul.f32 %v3002_v52, %v3475_v0 }
 0x16b   : >> { %1058 = vadd.xlane.f32.xlu1 %v806_v17  ;;  %vm4571_vm15 = vcmask 1043459  }
 0x16c   : >> { %v1471_v27 = vsel %vm1205_vm0, %v1470_v61, %v1466_v19  ;;  %1028 = vadd.xlane.f32.xlu0 %v791_v44  ;;  %v913_v24 = vpop.xlane.xlu1 %912 }
 0x16d   : >> { %v1480_v37 = vrot.slane %v913_v24, %v3835_v42  ;;  %v911_v41 = vpop.xlane.xlu0 %910 }
 0x16e   : >> { %v1475_v62 = vrot.slane %v911_v41, %v3815_v31 }
 0x16f   : >> { %1030 = vadd.xlane.f32.xlu1 %v792_v21 }
 0x170   : >> { %v1476_v45 = vsel %vm1212_vm1, %v1475_v62, %v1471_v27  ;;  %1000 = vadd.xlane.f32.xlu0 %v777_v30  ;;  %v917_v46 = vpop.xlane.xlu1 %916 }
 0x171   : >> { %v1490_v50 = vrot.slane %v917_v46, %v3851_v28  ;;  %v1481_v51 = vsel %vm1219_vm2, %v1480_v37, %v1476_v45  ;;  %v915_v17 = vpop.xlane.xlu0 %914 }
 0x172   : >> { %v1485_v20 = vrot.slane %v915_v17, %v3856_v58 }
 0x173   : >> { %1032 = vadd.xlane.f32.xlu1 %v793_v34 }
 0x174   : >> { %v1486_v56 = vsel %vm1226_vm3, %v1485_v20, %v1481_v51  ;;  %1060 = vadd.xlane.f32.xlu0 %v807_v47  ;;  %v921_v44 = vpop.xlane.xlu1 %920 }
 0x175   : >> { %v1500_v60 = vrot.slane %v921_v44, %v3871_v32  ;;  %v1491_v61 = vsel %vm1233_vm4, %v1490_v50, %v1486_v56  ;;  %v919_v63 = vpop.xlane.xlu0 %918 }
 0x176   : >> { %v1495_v19 = vrot.slane %v919_v63, %v3877_v36 }
 0x177   : >> { %1064 = vadd.xlane.f32.xlu1 %v809_v54 }
 0x178   : >> { %v1496_v21 = vsel %vm1240_vm5, %v1495_v19, %v1491_v61  ;;  %1062 = vadd.xlane.f32.xlu0 %v808_v59  ;;  %v925_v22 = vpop.xlane.xlu1 %924 }
 0x179   : >> { %v1510_v27 = vrot.slane %v925_v22, %v3890_v48  ;;  %v1501_v24 = vsel %vm1247_vm6, %v1500_v60, %v1496_v21  ;;  %v923_v30 = vpop.xlane.xlu0 %922 }
 0x17a   : >> { %v1505_v33 = vrot.slane %v923_v30, %v3895_v25 }
 0x17c   : >> { %v1506_v37 = vsel %vm1254_vm7, %v1505_v33, %v1501_v24  ;;  %v929_v41 = vpop.xlane.xlu1 %928 }
 0x17d   : >> { %v1520_v62 = vrot.slane %v929_v41, %v3911_v35  ;;  %v1511_v34 = vsel %vm1261_vm8, %v1510_v27, %v1506_v37  ;;  %v927_v55 = vpop.xlane.xlu0 %926 }
 0x17e   : >> { %v1515_v45 = vrot.slane %v927_v55, %v3916_v39 }
 0x180   : >> { %v1516_v46 = vsel %vm1268_vm9, %v1515_v45, %v1511_v34  ;;  %v933_v47 = vpop.xlane.xlu1 %932 }
 0x181   : >> { %v1530_v52 = vrot.slane %v933_v47, %v3926_v49  ;;  %v1521_v50 = vsel %vm1275_vm10, %v1520_v62, %v1516_v46  ;;  %v931_v51 = vpop.xlane.xlu0 %930 }
 0x182   : >> { %v1525_v17 = vrot.slane %v931_v51, %v3931_v57 }
 0x184   : >> { %v1526_v20 = vsel %vm1282_vm11, %v1525_v17, %v1521_v50  ;;  %v937_v54 = vpop.xlane.xlu1 %936 }
 0x185   : >> { %v1540_v56 = vrot.slane %v937_v54, %v3946_v38  ;;  %v1531_v44 = vsel %vm1289_vm12, %v1530_v52, %v1526_v20  ;;  %v935_v59 = vpop.xlane.xlu0 %934 }
 0x186   : >> { %v1535_v60 = vrot.slane %v935_v59, %v3950_v40 }
 0x188   : >> { %v1536_v61 = vsel %vm1296_vm13, %v1535_v60, %v1531_v44  ;;  %v941_v63 = vpop.xlane.xlu1 %940 }
 0x189   : >> { %v1541_v19 = vsel %vm1303_vm14, %v1540_v56, %v1536_v61  ;;  %v1549_v21 = vrot.slane %v941_v63, %v3838_v43  ;;  %v939_v22 = vpop.xlane.xlu0 %938 }
 0x18a   : >> { %v1863_v27 = vsel %vm4571_vm15, %v1541_v19, %v4133_v18  ;;  %v1545_v24 = vrot.slane %v939_v22, %v3821_v29  ;;  %vm1864_vm15 = vcmask 1044484  }
 0x18c   : >> { %v1550_v30 = vsel %vm1205_vm0, %v1549_v21, %v1545_v24  ;;  %v945_v33 = vpop.xlane.xlu1 %944 }
 0x18d   : >> { %v1559_v37 = vrot.slane %v945_v33, %v3835_v42  ;;  %v943_v41 = vpop.xlane.xlu0 %942 }
 0x18e   : >> { %v1554_v62 = vrot.slane %v943_v41, %v3815_v31 }
 0x190   : >> { %v1555_v34 = vsel %vm1212_vm1, %v1554_v62, %v1550_v30  ;;  %v949_v55 = vpop.xlane.xlu1 %948 }
 0x191   : >> { %v1569_v45 = vrot.slane %v949_v55, %v3851_v28  ;;  %v1560_v46 = vsel %vm1219_vm2, %v1559_v37, %v1555_v34  ;;  %v947_v47 = vpop.xlane.xlu0 %946 }
 0x192   : >> { %v1564_v18 = vrot.slane %v947_v47, %v3856_v58 }
 0x194   : >> { %v1565_v52 = vsel %vm1226_vm3, %v1564_v18, %v1560_v46  ;;  %v953_v50 = vpop.xlane.xlu1 %952 }
 0x195   : >> { %v1579_v51 = vrot.slane %v953_v50, %v3871_v32  ;;  %v1570_v17 = vsel %vm1233_vm4, %v1569_v45, %v1565_v52  ;;  %v951_v20 = vpop.xlane.xlu0 %950 }
 0x196   : >> { %v1574_v54 = vrot.slane %v951_v20, %v3877_v36 }
 0x198   : >> { %v1575_v56 = vsel %vm1240_vm5, %v1574_v54, %v1570_v17  ;;  %v957_v44 = vpop.xlane.xlu1 %956 }
 0x199   : >> { %v1589_v59 = vrot.slane %v957_v44, %v3890_v48  ;;  %v1580_v60 = vsel %vm1247_vm6, %v1579_v51, %v1575_v56  ;;  %v955_v61 = vpop.xlane.xlu0 %954 }
 0x19a   : >> { %v1584_v63 = vrot.slane %v955_v61, %v3895_v25 }
 0x19c   : >> { %v1585_v19 = vsel %vm1254_vm7, %v1584_v63, %v1580_v60  ;;  %v961_v21 = vpop.xlane.xlu1 %960 }
 0x19d   : >> { %v1599_v22 = vrot.slane %v961_v21, %v3911_v35  ;;  %v1590_v24 = vsel %vm1261_vm8, %v1589_v59, %v1585_v19  ;;  %v959_v30 = vpop.xlane.xlu0 %958 }
 0x19e   : >> { %v1594_v33 = vrot.slane %v959_v30, %v3916_v39 }
 0x1a0   : >> { %v1595_v37 = vsel %vm1268_vm9, %v1594_v33, %v1590_v24  ;;  %v965_v41 = vpop.xlane.xlu1 %964 }
 0x1a1   : >> { %v1609_v62 = vrot.slane %v965_v41, %v3926_v49  ;;  %v1600_v34 = vsel %vm1275_vm10, %v1599_v22, %v1595_v37  ;;  %v963_v55 = vpop.xlane.xlu0 %962 }
 0x1a2   : >> { %v1604_v45 = vrot.slane %v963_v55, %v3931_v57 }
 0x1a4   : >> { %v1605_v46 = vsel %vm1282_vm11, %v1604_v45, %v1600_v34  ;;  %v969_v47 = vpop.xlane.xlu1 %968 }
 0x1a5   : >> { %v1619_v18 = vrot.slane %v969_v47, %v3946_v38  ;;  %v1610_v52 = vsel %vm1289_vm12, %v1609_v62, %v1605_v46  ;;  %v967_v50 = vpop.xlane.xlu0 %966 }
 0x1a6   : >> { %v1614_v51 = vrot.slane %v967_v50, %v3950_v40 }
 0x1a8   : >> { %v1615_v17 = vsel %vm1296_vm13, %v1614_v51, %v1610_v52  ;;  %v973_v20 = vpop.xlane.xlu1 %972 }
 0x1a9   : >> { %v1620_v54 = vsel %vm1303_vm14, %v1619_v18, %v1615_v17  ;;  %v1628_v56 = vrot.slane %v973_v20, %v3838_v43  ;;  %v971_v44 = vpop.xlane.xlu0 %970 }
 0x1aa   : >> { %v1624_v59 = vrot.slane %v971_v44, %v3821_v29  ;;  %v4207_v60 = vsel %vm1864_vm15, %v1620_v54, %v1863_v27 }
 0x1ac   : >> { %v1629_v61 = vsel %vm1205_vm0, %v1628_v56, %v1624_v59  ;;  %v1003_v63 = vpop.xlane.xlu1 %1002 }
 0x1ad   : >> { %v1703_v19 = vrot.slane %v1003_v63, %v3821_v29  ;;  %v975_v21 = vpop.xlane.xlu0 %974 }
 0x1ae   : >> { %v1633_v22 = vrot.slane %v975_v21, %v3815_v31 }
 0x1b0   : >> { %v1634_v24 = vsel %vm1212_vm1, %v1633_v22, %v1629_v61  ;;  %v977_v30 = vpop.xlane.xlu1 %976 }
 0x1b1   : >> { %v1638_v33 = vrot.slane %v977_v30, %v3835_v42  ;;  %v1005_v37 = vpop.xlane.xlu0 %1004 }
 0x1b2   : >> { %v1707_v41 = vrot.slane %v1005_v37, %v3838_v43 }
 0x1b3   : >> { %v1639_v62 = vsel %vm1219_vm2, %v1638_v33, %v1634_v24 }
 0x1b4   : >> { %v1708_v27 = vsel %vm1205_vm0, %v1707_v41, %v1703_v19  ;;  %v1035_v34 = vpop.xlane.xlu1 %1034 }
 0x1b5   : >> { %v1007_v55 = vpop.xlane.xlu0 %1006  ;;  %v1782_v45 = vrot.slane %v1035_v34, %v3821_v29 }
 0x1b6   : >> { %v1712_v46 = vrot.slane %v1007_v55, %v3815_v31 }
 0x1b8   : >> { %v1713_v47 = vsel %vm1212_vm1, %v1712_v46, %v1708_v27  ;;  %v979_v18 = vpop.xlane.xlu1 %978 }
 0x1b9   : >> { %v1037_v52 = vpop.xlane.xlu0 %1036  ;;  %v1643_v50 = vrot.slane %v979_v18, %v3856_v58 }
 0x1ba   : >> { %v1786_v51 = vrot.slane %v1037_v52, %v3838_v43 }
 0x1bb   : >> { %v1644_v17 = vsel %vm1226_vm3, %v1643_v50, %v1639_v62 }
 0x1bc   : >> { %v1787_v20 = vsel %vm1205_vm0, %v1786_v51, %v1782_v45  ;;  %v1039_v54 = vpop.xlane.xlu1 %1038 }
 0x1bd   : >> { %v1009_v56 = vpop.xlane.xlu0 %1008  ;;  %v1791_v44 = vrot.slane %v1039_v54, %v3815_v31 }
 0x1be   : >> { %v1717_v59 = vrot.slane %v1009_v56, %v3835_v42 }
 0x1bf   : >> { %v1792_v61 = vsel %vm1212_vm1, %v1791_v44, %v1787_v20  ;;  %vm1866_vm1 = vcmask 1045509  }
 0x1c0   : >> { %v1718_v63 = vsel %vm1219_vm2, %v1717_v59, %v1713_v47  ;;  %v1011_v19 = vpop.xlane.xlu1 %1010 }
 0x1c1   : >> { %v981_v21 = vpop.xlane.xlu0 %980  ;;  %v1722_v22 = vrot.slane %v1011_v19, %v3856_v58 }
 0x1c2   : >> { %v1648_v24 = vrot.slane %v981_v21, %v3851_v28 }
 0x1c3   : >> { %v1723_v30 = vsel %vm1226_vm3, %v1722_v22, %v1718_v63 }
 0x1c4   : >> { %v1649_v33 = vsel %vm1233_vm4, %v1648_v24, %v1644_v17  ;;  %v983_v37 = vpop.xlane.xlu1 %982 }
 0x1c5   : >> { %v1041_v41 = vpop.xlane.xlu0 %1040  ;;  %v1653_v31 = vrot.slane %v983_v37, %v3877_v36 }
 0x1c6   : >> { %v1796_v62 = vrot.slane %v1041_v41, %v3835_v42 }
 0x1c7   : >> { %v1654_v27 = vsel %vm1240_vm5, %v1653_v31, %v1649_v33 }
 0x1c8   : >> { %v1797_v34 = vsel %vm1219_vm2, %v1796_v62, %v1792_v61  ;;  %v1043_v55 = vpop.xlane.xlu1 %1042  ;;  %vm1868_vm2 = vcmask 1046534  }
 0x1c9   : >> { %v1013_v45 = vpop.xlane.xlu0 %1012  ;;  %v1801_v46 = vrot.slane %v1043_v55, %v3856_v58 }
 0x1ca   : >> { %v1727_v47 = vrot.slane %v1013_v45, %v3851_v28 }
 0x1cb   : >> { %v1802_v18 = vsel %vm1226_vm3, %v1801_v46, %v1797_v34  ;;  %vm1870_vm3 = vcmask 1047559  }
 0x1cc   : >> { %v1728_v52 = vsel %vm1233_vm4, %v1727_v47, %v1723_v30  ;;  %v1015_v50 = vpop.xlane.xlu1 %1014 }
 0x1cd   : >> { %v985_v51 = vpop.xlane.xlu0 %984  ;;  %v1732_v17 = vrot.slane %v1015_v50, %v3877_v36 }
 0x1ce   : >> { %v1658_v42 = vrot.slane %v985_v51, %v3871_v32 }
 0x1cf   : >> { %v1733_v20 = vsel %vm1240_vm5, %v1732_v17, %v1728_v52 }
 0x1d0   : >> { %v1659_v54 = vsel %vm1247_vm6, %v1658_v42, %v1654_v27  ;;  %v987_v56 = vpop.xlane.xlu1 %986 }
 0x1d1   : >> { %v1045_v44 = vpop.xlane.xlu0 %1044  ;;  %v1663_v58 = vrot.slane %v987_v56, %v3895_v25 }
 0x1d2   : >> { %v1806_v59 = vrot.slane %v1045_v44, %v3851_v28 }
 0x1d3   : >> { %v1664_v61 = vsel %vm1254_vm7, %v1663_v58, %v1659_v54 }
 0x1d4   : >> { %v1807_v63 = vsel %vm1233_vm4, %v1806_v59, %v1802_v18  ;;  %v1047_v19 = vpop.xlane.xlu1 %1046 }
 0x1d5   : >> { %v1017_v21 = vpop.xlane.xlu0 %1016  ;;  %v1811_v22 = vrot.slane %v1047_v19, %v3877_v36 }
 0x1d6   : >> { %v1737_v24 = vrot.slane %v1017_v21, %v3871_v32 }
 0x1d7   : >> { %v1812_v30 = vsel %vm1240_vm5, %v1811_v22, %v1807_v63 }
 0x1d8   : >> { %v1738_v33 = vsel %vm1247_vm6, %v1737_v24, %v1733_v20  ;;  %v1019_v37 = vpop.xlane.xlu1 %1018 }
 0x1d9   : >> { %v989_v41 = vpop.xlane.xlu0 %988  ;;  %v1742_v31 = vrot.slane %v1019_v37, %v3895_v25 }
 0x1da   : >> { %v1668_v28 = vrot.slane %v989_v41, %v3890_v48 }
 0x1db   : >> { %v1743_v62 = vsel %vm1254_vm7, %v1742_v31, %v1738_v33 }
 0x1dc   : >> { %v1669_v27 = vsel %vm1261_vm8, %v1668_v28, %v1664_v61  ;;  %v991_v34 = vpop.xlane.xlu1 %990 }
 0x1dd   : >> { %v1049_v55 = vpop.xlane.xlu0 %1048  ;;  %v1673_v36 = vrot.slane %v991_v34, %v3916_v39 }
 0x1de   : >> { %v1816_v45 = vrot.slane %v1049_v55, %v3871_v32 }
 0x1df   : >> { %v1674_v46 = vsel %vm1268_vm9, %v1673_v36, %v1669_v27 }
 0x1e0   : >> { %v1817_v47 = vsel %vm1247_vm6, %v1816_v45, %v1812_v30  ;;  %v1051_v18 = vpop.xlane.xlu1 %1050 }
 0x1e1   : >> { %v1021_v52 = vpop.xlane.xlu0 %1020  ;;  %v1821_v50 = vrot.slane %v1051_v18, %v3895_v25 }
 0x1e2   : >> { %v1747_v51 = vrot.slane %v1021_v52, %v3890_v48 }
 0x1e3   : >> { %v1822_v17 = vsel %vm1254_vm7, %v1821_v50, %v1817_v47 }
 0x1e4   : >> { %v1748_v42 = vsel %vm1261_vm8, %v1747_v51, %v1743_v62  ;;  %v1023_v20 = vpop.xlane.xlu1 %1022 }
 0x1e5   : >> { %v993_v54 = vpop.xlane.xlu0 %992  ;;  %v1752_v56 = vrot.slane %v1023_v20, %v3916_v39 }
 0x1e6   : >> { %v1678_v32 = vrot.slane %v993_v54, %v3911_v35 }
 0x1e7   : >> { %v1753_v44 = vsel %vm1268_vm9, %v1752_v56, %v1748_v42 }
 0x1e8   : >> { %v1679_v58 = vsel %vm1275_vm10, %v1678_v32, %v1674_v46  ;;  %v995_v59 = vpop.xlane.xlu1 %994 }
 0x1e9   : >> { %v1053_v61 = vpop.xlane.xlu0 %1052  ;;  %v1683_v25 = vrot.slane %v995_v59, %v3931_v57 }
 0x1ea   : >> { %v1826_v63 = vrot.slane %v1053_v61, %v3890_v48 }
 0x1eb   : >> { %v1684_v19 = vsel %vm1282_vm11, %v1683_v25, %v1679_v58 }
 0x1ec   : >> { %v1827_v21 = vsel %vm1261_vm8, %v1826_v63, %v1822_v17  ;;  %v1055_v22 = vpop.xlane.xlu1 %1054 }
 0x1ed   : >> { %v1025_v24 = vpop.xlane.xlu0 %1024  ;;  %v1831_v30 = vrot.slane %v1055_v22, %v3916_v39 }
 0x1ee   : >> { %v1757_v33 = vrot.slane %v1025_v24, %v3911_v35 }
 0x1ef   : >> { %v1832_v37 = vsel %vm1268_vm9, %v1831_v30, %v1827_v21 }
 0x1f0   : >> { %v1758_v41 = vsel %vm1275_vm10, %v1757_v33, %v1753_v44  ;;  %v1027_v31 = vpop.xlane.xlu1 %1026 }
 0x1f1   : >> { %v997_v28 = vpop.xlane.xlu0 %996  ;;  %v1762_v62 = vrot.slane %v1027_v31, %v3931_v57 }
 0x1f2   : >> { %v1688_v48 = vrot.slane %v997_v28, %v3926_v49 }
 0x1f3   : >> { %v1763_v27 = vsel %vm1282_vm11, %v1762_v62, %v1758_v41 }
 0x1f4   : >> { %v1689_v34 = vsel %vm1289_vm12, %v1688_v48, %v1684_v19  ;;  %v999_v55 = vpop.xlane.xlu1 %998 }
 0x1f5   : >> { %v1057_v36 = vpop.xlane.xlu0 %1056  ;;  %v1693_v39 = vrot.slane %v999_v55, %v3950_v40 }
 0x1f6   : >> { %v1836_v45 = vrot.slane %v1057_v36, %v3911_v35 }
 0x1f7   : >> { %v1694_v46 = vsel %vm1296_vm13, %v1693_v39, %v1689_v34 }
 0x1f8   : >> { %v1837_v47 = vsel %vm1275_vm10, %v1836_v45, %v1832_v37  ;;  %v1059_v18 = vpop.xlane.xlu1 %1058 }
 0x1f9   : >> { %v1029_v52 = vpop.xlane.xlu0 %1028  ;;  %v1841_v50 = vrot.slane %v1059_v18, %v3931_v57 }
 0x1fa   : >> { %v1767_v51 = vrot.slane %v1029_v52, %v3926_v49 }
 0x1fb   : >> { %v1842_v17 = vsel %vm1282_vm11, %v1841_v50, %v1837_v47 }
 0x1fc   : >> { %v1768_v42 = vsel %vm1289_vm12, %v1767_v51, %v1763_v27  ;;  %v1031_v20 = vpop.xlane.xlu1 %1030 }
 0x1fd   : >> { %v1001_v54 = vpop.xlane.xlu0 %1000  ;;  %v1772_v56 = vrot.slane %v1031_v20, %v3950_v40 }
 0x1fe   : >> { %v1698_v35 = vrot.slane %v1001_v54, %v3946_v38 }
 0x1ff   : >> { %v1773_v32 = vsel %vm1296_vm13, %v1772_v56, %v1768_v42 }
 0x200   : >> { %v1699_v44 = vsel %vm1303_vm14, %v1698_v35, %v1694_v46  ;;  %v1033_v58 = vpop.xlane.xlu1 %1032 }
 0x201   : >> { %v1867_v57 = vsel %vm1866_vm1, %v1699_v44, %v4207_v60  ;;  %v1061_v59 = vpop.xlane.xlu0 %1060  ;;  %v1777_v61 = vrot.slane %v1033_v58, %v3946_v38 }
 0x202   : >> { %v1846_v25 = vrot.slane %v1061_v59, %v3926_v49 }
 0x203   : >> { %v1778_v63 = vsel %vm1303_vm14, %v1777_v61, %v1773_v32 }
 0x204   : >> { %v1847_v19 = vsel %vm1289_vm12, %v1846_v25, %v1842_v17  ;;  %v1869_v21 = vsel %vm1868_vm2, %v1778_v63, %v1867_v57  ;;  %v1065_v22 = vpop.xlane.xlu1 %1064 }
 0x205   : >> { %v1063_v24 = vpop.xlane.xlu0 %1062  ;;  %v1856_v30 = vrot.slane %v1065_v22, %v3946_v38  ;;  %325 = sbr.rel (!%p323_p3) target bundleno = 95 (0x5f), region = 128  ;;  %v4310_v38 = vld [vmem:[%s3463_s25 + $0x80] sm:$0xff] (%p323_p3) }
 0x206   : >> { %v1851_v60 = vrot.slane %v1063_v24, %v3950_v40  ;;  %v4313_v40 = vld [vmem:[%s3463_s25 + $0x88] sm:$0xff] (%p323_p3) }
 0x208   : >> { %v1852_v33 = vsel %vm1296_vm13, %v1851_v60, %v1847_v19 }
 0x209   : >> { %v1857_v49 = vsel %vm1303_vm14, %v1856_v30, %v1852_v33 }
 0x20a   : >> { %v1871_v37 = vsel %vm1870_vm3, %v1857_v49, %v1869_v21 }
 0x20b   : >> { %1879 = vst [vmem:[%s1878_s22] sm:$0xff] %v1871_v37 }
 0x20c LB: >> { %s2583_s27 = sshll.u32 %s3248_s9, 3  ;;  %vm4581_vm4 = vcmask 1041409   ;;  %vm4582_vm5 = vcmask 1042434   ;;  %vm4583_vm6 = vcmask 1043459   ;;  %vm2179_vm7 = vcmask 130048   ;;  %s1887_s9 = sadd.s32 1, %s3248_s9   ;;  %s3248_s9 = sphi %s4315_s9, %s1887_s9  }
 0x20d   : >> { %s1889_s12 = scalar_lea.vmem %s3455_s6, %s2583_s27 [#allocation3]  ;;  %s2174_s11 = sshra.s32 %s2583_s27, 3 }
 0x20e   : >> { %v1890_v41 = vld [vmem:[%s1889_s12] sm:$0xff]  ;;  %s2594_s24 = sshll.u32 %s2174_s11, 4  ;;  %p1884_p12 = scmp.ge.s32.totalorder %s1887_s9, 3  }
 0x20f   : >> { %v1899_v1 = vrot.slane %v1890_v41, %v3544_v23  ;;  %v1892_v2 = vcombine.high %v1890_v41, %v1890_v41  ;;  %s2178_s14 = scalar_lea.vmem [#allocation2], %s2594_s24  ;;  %s2649_s6 = smul.u32 (%p1884_p12), 768, %s3232_s18 }
 0x210   : > { %s2400_s8 = sshll.u32 (%p1884_p12), %s3529_s10, 4  ;;  %s2366_s5 = scalar_lea.sflag (%p1884_p12), [#allocation10], %s3449_s26  ;;  %s4476_s8 = int_to_ptr.vmem [resolvable:$true] %s2400_s8 }
 0x211   : >> { %v1915_v3 = vrot.slane %v1899_v1, %v3544_v23  ;;  %v1907_v4 = vcombine.high %v1899_v1, %v1899_v1  ;;  %v1906_v5 = vrot.slane %v1892_v2, %v3544_v23  ;;  %s4473_s7 = scalar_lea.hbm (%p1884_p12), %s4565_s4, %s2649_s6  ;;  %s3114_s22 = scalar_lea.vmem (%p1884_p12), %s4476_s8, 768 }
 0x212   : > { %p3115_p13 = scmp.ne.s32.totalorder (%p1884_p12), %s4476_s8, %s3114_s22  ;;  %p4584_p7 = scmp.ne.s32.totalorder (%p1884_p12), %s4574_s28, 0 }
 0x213   : >> { %v1944_v6 = vrot.slane %v1915_v3, %v3548_v26  ;;  %v1929_v7 = vrot.slane %v1907_v4, %v3544_v23  ;;  %v1937_v8 = vcombine.high %v1915_v3, %v1915_v3  ;;  %v1922_v9 = vrot.slane %v1906_v5, %v3544_v23  ;;  %s3256_s9 = smov (%p1884_p12), [#allocation9]  }
 0x214   : >> { %v1908_v16 = vcombine.high %v1906_v5, %v1906_v5  ;;  %p3116_p10 = pnand (%p1884_p12), %p3115_p13, %p4584_p7  ;;  %s3118_s27 = sshll.u32 (%p1884_p12), %s3256_s9, 4  ;;  %s3119_s27 = int_to_ptr.vmem [resolvable:$false] %s3118_s27 }
 0x215   : >> { %v1981_v10 = vadd.f32 %v1944_v6, %v4310_v38  ;;  %v1948_v11 = vrot.slane %v1929_v7, %v3548_v26  ;;  %v1982_v12 = vadd.f32 %v1944_v6, %v4313_v40  ;;  %v1952_v13 = vrot.slane %v1937_v8, %v3548_v26  ;;  %s3120_s12 = scalar_lea.vmem (%p1884_p12), %s3119_s27, 1536  ;;  %p3121_p11 = scmp.lt.s32.totalorder (%p1884_p12), %s4476_s8, %s3119_s27 }
 0x216   : >> { %v1960_v14 = vrot.slane %v1922_v9, %v3548_v26  ;;  %v1939_v15 = vcombine.high %v1929_v7, %v1929_v7  ;;  %v1936_v55 = vrot.slane %v1908_v16, %v3544_v23  ;;  %v1938_v46 = vcombine.high %v1922_v9, %v1922_v9  ;;  %p3117_p9 = pneg (%p1884_p12), %p3116_p10  ;;  %p3122_p1 = scmp.lt.s32.totalorder (%p1884_p12), %s3120_s12, %s3114_s22 }
 0x217   : >> { %3004 = vtanh.f32 %v1981_v10  ;;  %v1983_v31 = vadd.f32 %v1948_v11, %v4310_v38  ;;  %v1984_v28 = vadd.f32 %v1948_v11, %v4313_v40  ;;  %v1985_v62 = vadd.f32 %v1952_v13, %v4310_v38 }
 0x218   : >> { %3006 = vtanh.f32 %v1982_v12  ;;  %v1986_v48 = vadd.f32 %v1952_v13, %v4313_v40  ;;  %v1989_v27 = vadd.f32 %v1960_v14, %v4310_v38  ;;  %v1956_v34 = vrot.slane %v1939_v15, %v3548_v26  ;;  %p3123_p5 = por (%p1884_p12), %p3122_p1, %p3121_p11 }
 0x219   : >> { %3008 = vtanh.f32 %v1983_v31  ;;  %v1990_v36 = vadd.f32 %v1960_v14, %v4313_v40  ;;  %v1964_v45 = vrot.slane %v1936_v55, %v3548_v26  ;;  %v1968_v42 = vrot.slane %v1938_v46, %v3548_v26 }
 0x21a   : >> { %3010 = vtanh.f32 %v1984_v28  ;;  %v1987_v39 = vadd.f32 %v1956_v34, %v4310_v38  ;;  %v1988_v18 = vadd.f32 %v1956_v34, %v4313_v40  ;;  %v1940_v20 = vcombine.high %v1936_v55, %v1936_v55  ;;  %p3124_p2 = pnand (%p1884_p12), %p3123_p5, %p3117_p9 }
 0x21b   : >> { %3012 = vtanh.f32 %v1985_v62  ;;  %v1991_v17 = vadd.f32 %v1964_v45, %v4310_v38  ;;  %v1992_v44 = vadd.f32 %v1964_v45, %v4313_v40  ;;  %v1993_v59 = vadd.f32 %v1968_v42, %v4310_v38 }
 0x21c   : >> { %3014 = vtanh.f32 %v1986_v48  ;;  %v1972_v61 = vrot.slane %v1940_v20, %v3548_v26  ;;  %v1994_v19 = vadd.f32 %v1968_v42, %v4313_v40 }
 0x21d   : >> { %3016 = vtanh.f32 %v1989_v27 }
 0x21e   : >> { %3018 = vtanh.f32 %v1990_v36  ;;  %v1995_v24 = vadd.f32 %v1972_v61, %v4310_v38  ;;  %v1996_v33 = vadd.f32 %v1972_v61, %v4313_v40  ;;  %v3255_v38 = vmov (%p1884_p12), 0.0|0.0  }
 0x21f   : >> { %3020 = vtanh.f32 %v1987_v39  ;;  %2623 = vmatprep.subr.bf16.mxu1 (%p1884_p12), %v3255_v38  ;;  %2596 = vmatprep.subr.bf16.mxu0 (%p1884_p12), %v3255_v38 }
 0x220   : >> { %3022 = vtanh.f32 %v1988_v18 }
 0x221   : >> { %v3005_v47 = vpop.eup %3004  ;;  %3024 = vtanh.f32 %v1991_v17 }
 0x222   : >> { %v3007_v52 = vpop.eup %3006  ;;  %v2019_v50 = vmul.f32 %v3005_v47, %v3475_v0  ;;  %3026 = vtanh.f32 %v1992_v44 }
 0x223   : >> { %v3009_v51 = vpop.eup %3008  ;;  %v2020_v35 = vmul.f32 %v3007_v52, %v3475_v0  ;;  %3028 = vtanh.f32 %v1993_v59 }
 0x224   : >> { %v3011_v54 = vpop.eup %3010  ;;  %2035 = vadd.xlane.f32.xlu0 %v2019_v50  ;;  %v2021_v56 = vmul.f32 %v3009_v51, %v3475_v0  ;;  %3030 = vtanh.f32 %v1994_v19 }
 0x225   : >> { %v3013_v32 = vpop.eup %3012  ;;  %v2022_v58 = vmul.f32 %v3011_v54, %v3475_v0  ;;  %3032 = vtanh.f32 %v1995_v24 }
 0x226   : >> { %2039 = vadd.xlane.f32.xlu1 %v2021_v56  ;;  %v3015_v57 = vpop.eup %3014  ;;  %v2023_v25 = vmul.f32 %v3013_v32, %v3475_v0  ;;  %3034 = vtanh.f32 %v1996_v33 }
 0x227   : >> { %v3017_v63 = vpop.eup %3016  ;;  %v2024_v21 = vmul.f32 %v3015_v57, %v3475_v0 }
 0x228   : >> { %2037 = vadd.xlane.f32.xlu0 %v2020_v35  ;;  %v3019_v22 = vpop.eup %3018  ;;  %v2027_v30 = vmul.f32 %v3017_v63, %v3475_v0 }
 0x229   : >> { %v3021_v60 = vpop.eup %3020  ;;  %v2028_v49 = vmul.f32 %v3019_v22, %v3475_v0 }
 0x22a   : >> { %2041 = vadd.xlane.f32.xlu1 %v2022_v58  ;;  %v3023_v37 = vpop.eup %3022  ;;  %v2025_v41 = vmul.f32 %v3021_v60, %v3475_v0 }
 0x22b   : >> { %v3025_v1 = vpop.eup %3024  ;;  %v2026_v2 = vmul.f32 %v3023_v37, %v3475_v0 }
 0x22c   : >> { %2043 = vadd.xlane.f32.xlu0 %v2023_v25  ;;  %v3027_v3 = vpop.eup %3026  ;;  %v2029_v4 = vmul.f32 %v3025_v1, %v3475_v0 }
 0x22d   : >> { %v3029_v5 = vpop.eup %3028  ;;  %v2030_v6 = vmul.f32 %v3027_v3, %v3475_v0 }
 0x22e   : >> { %2045 = vadd.xlane.f32.xlu1 %v2024_v21  ;;  %v3031_v7 = vpop.eup %3030  ;;  %v2031_v8 = vmul.f32 %v3029_v5, %v3475_v0 }
 0x22f   : >> { %v3033_v9 = vpop.eup %3032  ;;  %v2032_v10 = vmul.f32 %v3031_v7, %v3475_v0  ;;  %v2189_v7 = vadd.s32 (%p1884_p12), 128, %v3793_v53  ;;  %v2249_v53 = vld [vmem:[%s3463_s25] sm:$0xff] (%p1884_p12) }
 0x230   : >> { %2051 = vadd.xlane.f32.xlu0 %v2027_v30  ;;  %v3035_v11 = vpop.eup %3034  ;;  %v2033_v12 = vmul.f32 %v3033_v9, %v3475_v0 }
 0x231   : >> { %v2034_v13 = vmul.f32 %v3035_v11, %v3475_v0  ;;  %vm2191_vm8 = vcmp.lt.s32.totalorder (%p1884_p12), %v2189_v7, 144 }
 0x232   : >> { %2053 = vadd.xlane.f32.xlu1 %v2028_v49 }
 0x234   : >> { %2047 = vadd.xlane.f32.xlu0 %v2025_v41 }
 0x236   : >> { %2049 = vadd.xlane.f32.xlu1 %v2026_v2 }
 0x238   : >> { %2055 = vadd.xlane.f32.xlu0 %v2029_v4 }
 0x23a   : >> { %2057 = vadd.xlane.f32.xlu1 %v2030_v6 }
 0x23c   : >> { %2059 = vadd.xlane.f32.xlu0 %v2031_v8 }
 0x23e   : >> { %2061 = vadd.xlane.f32.xlu1 %v2032_v10 }
 0x240   : >> { %2063 = vadd.xlane.f32.xlu0 %v2033_v12 }
 0x242   : >> { %2065 = vadd.xlane.f32.xlu1 %v2034_v13 }
 0x2b1   : >> { %v2036_v14 = vpop.xlane.xlu0 %2035 }
 0x2b2   : >> { %v2088_v17 = vrot.slane %v2036_v14, %v3821_v29 }
 0x2b3   : >> { %v2040_v15 = vpop.xlane.xlu1 %2039 }
 0x2b4   : >> { %v2099_v47 = vrot.slane %v2040_v15, %v3821_v29  ;;  %v2252_v15 = vld [vmem:[%s3463_s25 + $0x18] sm:$0xff] (%p1884_p12) }
 0x2b5   : >> { %v2038_v16 = vpop.xlane.xlu0 %2037 }
 0x2b6   : >> { %v2093_v18 = vrot.slane %v2038_v16, %v3838_v43 }
 0x2b7   : >> { %v2042_v31 = vpop.xlane.xlu1 %2041 }
 0x2b8   : >> { %v2103_v36 = vrot.slane %v2042_v31, %v3838_v43  ;;  %v2095_v56 = vsel %vm1205_vm0, %v2093_v18, %v2088_v17  ;;  %v2253_v31 = vld [vmem:[%s3463_s25 + $0x20] sm:$0xff] (%p1884_p12) }
 0x2b9   : >> { %v2044_v28 = vpop.xlane.xlu0 %2043 }
 0x2ba   : >> { %v2108_v39 = vrot.slane %v2044_v28, %v3821_v29  ;;  %v2104_v42 = vsel %vm1205_vm0, %v2103_v36, %v2099_v47  ;;  %v2254_v28 = vld [vmem:[%s3463_s25 + $0x28] sm:$0xff] (%p1884_p12) }
 0x2bb   : >> { %v2046_v62 = vpop.xlane.xlu1 %2045  ;;  %v2160_v58 = vsel %vm4581_vm4, %v2104_v42, %v2095_v56  ;;  %v2258_v36 = vld [vmem:[%s3463_s25 + $0x48] sm:$0xff] (%p1884_p12) }
 0x2bc   : >> { %v2112_v45 = vrot.slane %v2046_v62, %v3838_v43  ;;  %v2603_v62 = vpack.c.bf16 (%p1884_p12), %v2254_v28, %v2253_v31 }
 0x2bd   : >> { %v2052_v48 = vpop.xlane.xlu0 %2051 }
 0x2be   : >> { %v2113_v20 = vsel %vm1205_vm0, %v2112_v45, %v2108_v39  ;;  %v2126_v59 = vrot.slane %v2052_v48, %v3821_v29  ;;  %v2255_v48 = vld [vmem:[%s3463_s25 + $0x30] sm:$0xff] (%p1884_p12) }
 0x2bf   : >> { %v2054_v27 = vpop.xlane.xlu1 %2053  ;;  %v2162_v63 = vsel %vm4582_vm5, %v2113_v20, %v2160_v58  ;;  %v2259_v45 = vld [vmem:[%s3463_s25 + $0x50] sm:$0xff] (%p1884_p12) }
 0x2c0   : >> { %v2130_v57 = vrot.slane %v2054_v27, %v3838_v43  ;;  %v2256_v27 = vld [vmem:[%s3463_s25 + $0x38] sm:$0xff] (%p1884_p12) }
 0x2c1   : >> { %v2048_v34 = vpop.xlane.xlu0 %2047 }
 0x2c2   : >> { %v2117_v50 = vrot.slane %v2048_v34, %v3821_v29  ;;  %v2131_v60 = vsel %vm1205_vm0, %v2130_v57, %v2126_v59  ;;  %v2606_v34 = vpack.c.bf16 (%p1884_p12), %v2256_v27, %v2255_v48 }
 0x2c3   : >> { %v2050_v55 = vpop.xlane.xlu1 %2049 }
 0x2c4   : >> { %v2121_v52 = vrot.slane %v2050_v55, %v3838_v43  ;;  %v2257_v55 = vld [vmem:[%s3463_s25 + $0x40] sm:$0xff] (%p1884_p12) }
 0x2c5   : >> { %v2056_v46 = vpop.xlane.xlu0 %2055  ;;  %v2609_v39 = vpack.c.bf16 (%p1884_p12), %v2258_v36, %v2257_v55 }
 0x2c6   : >> { %v2122_v35 = vsel %vm1205_vm0, %v2121_v52, %v2117_v50  ;;  %v2135_v44 = vrot.slane %v2056_v46, %v3821_v29  ;;  %v2260_v46 = vld [vmem:[%s3463_s25 + $0x58] sm:$0xff] (%p1884_p12) }
 0x2c7   : >> { %v2058_v51 = vpop.xlane.xlu1 %2057  ;;  %v2164_v21 = vsel %vm4583_vm6, %v2122_v35, %v2162_v63  ;;  %v2612_v47 = vpack.c.bf16 (%p1884_p12), %v2260_v46, %v2259_v45 }
 0x2c8   : >> { %v2139_v32 = vrot.slane %v2058_v51, %v3838_v43  ;;  %v2166_v37 = vsel %vm1864_vm15, %v2131_v60, %v2164_v21 }
 0x2c9   : >> { %v2060_v54 = vpop.xlane.xlu0 %2059 }
 0x2ca   : >> { %v2144_v25 = vrot.slane %v2060_v54, %v3821_v29  ;;  %v2140_v24 = vsel %vm1205_vm0, %v2139_v32, %v2135_v44 }
 0x2cb   : >> { %v2062_v61 = vpop.xlane.xlu1 %2061  ;;  %v2168_v1 = vsel %vm1866_vm1, %v2140_v24, %v2166_v37 }
 0x2cc   : >> { %v2148_v19 = vrot.slane %v2062_v61, %v3838_v43 }
 0x2cd   : >> { %v2064_v22 = vpop.xlane.xlu0 %2063 }
 0x2ce   : >> { %v2153_v30 = vrot.slane %v2064_v22, %v3821_v29  ;;  %v2149_v33 = vsel %vm1205_vm0, %v2148_v19, %v2144_v25  ;;  %1886 = sbr.rel (!%p1884_p12) target bundleno = 524 (0x20c), region = 139  ;;  %v2250_v29 = vld [vmem:[%s3463_s25 + $0x8] sm:$0xff] (%p1884_p12) }
 0x2cf   : >> { %v2066_v49 = vpop.xlane.xlu1 %2065  ;;  %v2170_v2 = vsel %vm1868_vm2, %v2149_v33, %v2168_v1  ;;  %v2597_v40 = vpack.c.bf16 (%p1884_p12), %v2250_v29, %v2249_v53  ;;  %v2261_v33 = vld [vmem:[%s3463_s25 + $0x60] sm:$0xff] (%p1884_p12)  ;;  %v2264_v1 = vld [vmem:[%s3463_s25 + $0x78] sm:$0xff] (%p1884_p12) }
 0x2d0   : >> { %v2157_v41 = vrot.slane %v2066_v49, %v3838_v43  ;;  %v2251_v43 = vld [vmem:[%s3463_s25 + $0x10] sm:$0xff] (%p1884_p12)  ;;  %v2262_v49 = vld [vmem:[%s3463_s25 + $0x68] sm:$0xff] (%p1884_p12) }
 0x2d1   : > { %2632 = vmatpush1.bf16.msra.mxu1 (%p1884_p12), %v2597_v40  ;;  %2598 = vmatpush1.bf16.msra.mxu0 (%p1884_p12), %v2597_v40  ;;  %v2600_v16 = vpack.c.bf16 (%p1884_p12), %v2252_v15, %v2251_v43  ;;  %v2615_v37 = vpack.c.bf16 (%p1884_p12), %v2262_v49, %v2261_v33 }
 0x2d2   : >> { %v2158_v3 = vsel %vm1205_vm0, %v2157_v41, %v2153_v30  ;;  %2624 = vmatprep.subr.bf16.mxu1 (%p1884_p12), %v3255_v38  ;;  %2599 = vmatprep.subr.bf16.mxu0 (%p1884_p12), %v3255_v38  ;;  %v2263_v41 = vld [vmem:[%s3463_s25 + $0x70] sm:$0xff] (%p1884_p12) }
 0x2d3   : >> { %v2172_v4 = vsel %vm1870_vm3, %v2158_v3, %v2170_v2  ;;  %v2265_v2 = vld [vmem:[%s3463_s25 + $0x80] sm:$0xff] (%p1884_p12)  ;;  %v2618_v3 = vpack.c.bf16 (%p1884_p12), %v2264_v1, %v2263_v41 }
 0x2d4   : >> { %2180 = vst.msk [vmem:[%s2178_s14 + $0x8] sm:$0xff] %vm2179_vm7, %v2172_v4  ;;  %v2266_v4 = vld [vmem:[%s3463_s25 + $0x88] sm:$0xff] (%p1884_p12) }
 0x2d5   : > { %2633 = vmatpush1.bf16.msra.mxu1 %v2600_v16  ;;  %2601 = vmatpush1.bf16.msra.mxu0 %v2600_v16 }
 0x2d6   : > { %2625 = vmatprep.subr.bf16.mxu1 %v3255_v38  ;;  %2602 = vmatprep.subr.bf16.mxu0 %v3255_v38 }
 0x2d9   : > { %2634 = vmatpush1.bf16.msra.mxu1 %v2603_v62  ;;  %2604 = vmatpush1.bf16.msra.mxu0 %v2603_v62 }
 0x2da   : > { %2626 = vmatprep.subr.bf16.mxu1 %v3255_v38  ;;  %2605 = vmatprep.subr.bf16.mxu0 %v3255_v38 }
 0x2db   : > { %v4407_v5 = vld [vmem:[#allocation2 + $0x10] sm:$0xff]  ;;  %v2184_v6 = vld [vmem:[#allocation2 + $0x18] sm:$0xff]  ;;  %v4410_v8 = vld [vmem:[#allocation2 + $0x20] sm:$0xff] }
 0x2dc   : > { %v2186_v9 = vld [vmem:[#allocation2 + $0x28] sm:$0xff]  ;;  %v4412_v11 = vld [vmem:[#allocation2] sm:$0xff]  ;;  %v2195_v12 = vsel %vm2191_vm8, %v2184_v6, -1e+30 }
 0x2dd   : > { %v2182_v10 = vld [vmem:[#allocation2 + $0x8] sm:$0xff]  ;;  %v2197_v13 = vsel %vm2191_vm8, %v2186_v9, -1e+30  ;;  %v2201_v0 = vmax.f32 %v4407_v5, %v2195_v12  ;;  %2635 = vmatpush1.bf16.msra.mxu1 %v2606_v34  ;;  %2607 = vmatpush1.bf16.msra.mxu0 %v2606_v34 }
 0x2de   : > { %v4414_v14 = vsel %vm2191_vm8, %v2182_v10, -1e+30  ;;  %v2204_v23 = vmax.f32 %v4410_v8, %v2197_v13  ;;  %2627 = vmatprep.subr.bf16.mxu1 %v3255_v38  ;;  %2608 = vmatprep.subr.bf16.mxu0 %v3255_v38 }
 0x2df   : > { %2202 = vmax.xlane.f32.xlu0 %v2201_v0  ;;  %v2198_v26 = vmax.f32 %v4412_v11, %v4414_v14 }
 0x2e0   : > { %2205 = vmax.xlane.f32.xlu1 %v2204_v23 }
 0x2e1   : > { %2636 = vmatpush1.bf16.msra.mxu1 %v2609_v39  ;;  %2610 = vmatpush1.bf16.msra.mxu0 %v2609_v39 }
 0x2e2   : > { %2628 = vmatprep.subr.bf16.mxu1 %v3255_v38  ;;  %2611 = vmatprep.subr.bf16.mxu0 %v3255_v38 }
 0x2e3   : > { %2199 = vmax.xlane.f32.xlu0 %v2198_v26 }
 0x2e5   : > { %2637 = vmatpush1.bf16.msra.mxu1 %v2612_v47  ;;  %2613 = vmatpush1.bf16.msra.mxu0 %v2612_v47 }
 0x2e6   : > { %2629 = vmatprep.subr.bf16.mxu1 %v3255_v38  ;;  %2614 = vmatprep.subr.bf16.mxu0 %v3255_v38 }
 0x2e9   : > { %2638 = vmatpush1.bf16.msra.mxu1 %v2615_v37  ;;  %2616 = vmatpush1.bf16.msra.mxu0 %v2615_v37 }
 0x2ea   : > { %2630 = vmatprep.subr.bf16.mxu1 %v3255_v38  ;;  %2617 = vmatprep.subr.bf16.mxu0 %v3255_v38 }
 0x2ed   : > { %2639 = vmatpush1.bf16.msra.mxu1 %v2618_v3  ;;  %2619 = vmatpush1.bf16.msra.mxu0 %v2618_v3 }
 0x2ee   : > { %2631 = vmatprep.subr.bf16.mxu1 %v3255_v38  ;;  %2620 = vmatprep.subr.bf16.mxu0 %v3255_v38 }
 0x36c   : > { %v2203_v18 = vpop.xlane.xlu0 %2202 }
 0x36d   : > { %v2206_v52 = vpop.xlane.xlu1 %2205  ;;  %v2209_v50 = vsub.f32 %v4407_v5, %v2203_v18  ;;  %v2210_v51 = vsub.f32 %v2195_v12, %v2203_v18  ;;  %v2621_v5 = vpack.c.bf16 %v2266_v4, %v2265_v2 }
 0x36e   : > { %v2211_v17 = vsub.f32 %v4410_v8, %v2206_v52  ;;  %v2212_v42 = vsub.f32 %v2197_v13, %v2206_v52 }
 0x36f   : > { %v2217_v20 = vmul.f32 1.442695, %v2209_v50  ;;  %v2219_v54 = vmul.f32 1.442695, %v2210_v51  ;;  %2640 = vmatpush1.bf16.msra.mxu1 %v2621_v5  ;;  %2622 = vmatpush1.bf16.msra.mxu0 %v2621_v5 }
 0x370   : > { %v2221_v56 = vmul.f32 1.442695, %v2211_v17  ;;  %v2223_v35 = vmul.f32 1.442695, %v2212_v42  ;;  %v2200_v32 = vpop.xlane.xlu0 %2199 }
 0x371   : > { %3036 = vpow2.f32 %v2217_v20  ;;  %v2207_v44 = vsub.f32 %v4412_v11, %v2200_v32  ;;  %v2208_v58 = vsub.f32 %v4414_v14, %v2200_v32 }
 0x372   : > { %3038 = vpow2.f32 %v2219_v54 }
 0x373   : > { %3040 = vpow2.f32 %v2221_v56  ;;  %v2213_v57 = vmul.f32 1.442695, %v2207_v44  ;;  %v2215_v59 = vmul.f32 1.442695, %v2208_v58 }
 0x374   : > { %3042 = vpow2.f32 %v2223_v35 }
 0x375   : > { %3044 = vpow2.f32 %v2213_v57 }
 0x376   : > { %3046 = vpow2.f32 %v2215_v59 }
 0x37b   : > { %v3037_v61 = vpop.eup %3036 }
 0x37c   : > { %v3039_v25 = vpop.eup %3038 }
 0x37d   : > { %v3041_v63 = vpop.eup %3040  ;;  %v2228_v19 = vadd.f32 %v3039_v25, %v3037_v61 }
 0x37e   : > { %v3043_v21 = vpop.eup %3042 }
 0x37f   : > { %v3045_v22 = vpop.eup %3044  ;;  %2229 = vadd.xlane.f32.xlu1 %v2228_v19  ;;  %v2231_v24 = vadd.f32 %v3043_v21, %v3041_v63 }
 0x380   : > { %v3047_v30 = vpop.eup %3046 }
 0x381   : > { %v2225_v60 = vadd.f32 %v3047_v30, %v3045_v22 }
 0x383   : > { %2232 = vadd.xlane.f32.xlu1 %v2231_v24  ;;  %2226 = vadd.xlane.f32.xlu0 %v2225_v60 }
 0x40c   : > { %v2230_v6 = vpop.xlane.xlu1 %2229 }
 0x40d   : > { %3048 = vrcp.f32 %v2230_v6 }
 0x410   : > { %v2233_v7 = vpop.xlane.xlu1 %2232  ;;  %v2227_v8 = vpop.xlane.xlu0 %2226 }
 0x411   : > { %3050 = vrcp.f32 %v2233_v7 }
 0x412   : > { %3052 = vrcp.f32 %v2227_v8 }
 0x417   : > { %v3049_v9 = vpop.eup %3048 }
 0x418   : > { %v2240_v10 = vmul.f32 %v3049_v9, %v3039_v25  ;;  %v2239_v11 = vmul.f32 %v3049_v9, %v3037_v61 }
 0x41a   : > { %2246 = vst [vmem:[%s3529_s10 + $0x18] sm:$0xff] %v2240_v10  ;;  %2587 = vmatprep.mubr.msk.f32.mxu1 %vm2179_vm7, %v2240_v10  ;;  %2245 = vst [vmem:[%s3529_s10 + $0x10] sm:$0xff] %v2239_v11 }
 0x41b   : > { %v3051_v12 = vpop.eup %3050  ;;  %2347 = vmatmul.mubr.f32.vlgmr.msra.gmra.mrb[0].mxu1 %v2239_v11 }
 0x41c   : > { %v3053_v13 = vpop.eup %3052  ;;  %v2242_v14 = vmul.f32 %v3051_v12, %v3043_v21  ;;  %v2241_v0 = vmul.f32 %v3051_v12, %v3041_v63 }
 0x41d   : > { %v2238_v23 = vmul.f32 %v3053_v13, %v3047_v30  ;;  %v2237_v26 = vmul.f32 %v3053_v13, %v3045_v22 }
 0x41e   : > { %2248 = vst [vmem:[%s3529_s10 + $0x28] sm:$0xff] %v2242_v14  ;;  %2588 = vmatprep.mubr.msk.f32.mxu1 %vm2179_vm7, %v2242_v14  ;;  %2247 = vst [vmem:[%s3529_s10 + $0x20] sm:$0xff] %v2241_v0 }
 0x41f   : > { %2244 = vst [vmem:[%s3529_s10 + $0x8] sm:$0xff] %v2238_v23  ;;  %2586 = vmatprep.mubr.msk.f32.mxu0 %vm2179_vm7, %v2238_v23  ;;  %2243 = vst [vmem:[%s3529_s10] sm:$0xff] %v2237_v26  ;;  %2352 = vmatmul.mubr.f32.gmra.mrb[2].mxu1 %v2241_v0 }
 0x420   : > { %2342 = vmatmul.mubr.f32.vlgmr.msra.gmra.mrb[0].mxu0 %v2237_v26 }
 0x421   : > { %3127 = shalt.err (!%p3124_p2)
}
 0x422   : > { %s3128_s10 = scalar_lea.hbm %s4473_s7, 768  ;;  %s3132_s14 = scalar_lea.hbm %s4565_s4, 1536 }
 0x423   : > { %p3129_p4 = scmp.ne.s32.totalorder %s4473_s7, %s3128_s10  ;;  %p3133_p0 = scmp.lt.u32.totalorder %s4473_s7, %s4565_s4 }
 0x424   : > { %p3134_p3 = scmp.lt.u32.totalorder %s3132_s14, %s3128_s10  ;;  %p3136_p13 = scmp.lt.u32.totalorder %s3128_s10, %s4473_s7 }
 0x425   : > { %p3130_p6 = pnand %p3129_p4, %p4584_p7 }
 0x426   : > { %p3135_p12 = por %p3134_p3, %p3133_p0 }
 0x427   : > { %p3131_p8 = pneg %p3130_p6 }
 0x428   : > { %p3137_p10 = por %p3136_p13, %p3135_p12 }
 0x42a   : > { %p3138_p9 = pnand %p3137_p10, %p3131_p8 }
 0x42c   : > { %3141 = shalt.err (!%p3138_p9)
}
 0x42d   : > { %s3257_s13 = smov 256   ;;  %s3258_s22 = smov 16  }
 0x42e   : > { %2655 = dma.vmem_to_hbm [thread:$0]  (%p4584_p7), %s4476_s8, 768, %s4473_s7, %s2366_s5, %s3257_s13, %s3257_s13, %s3258_s22  }
 0x42f   : > { %s2648_s9 = smul.u32 384, %s3232_s18  ;;  %s2381_s27 = sshll.u32 %s3527_s21, 4  ;;  %s4510_s27 = int_to_ptr.vmem [resolvable:$true] %s2381_s27 }
 0x430   : > { %s2361_s18 = scalar_lea.sflag [#allocation5], %s3449_s26  ;;  %s3142_s7 = scalar_lea.vmem %s4510_s27, 384 }
 0x431   : > { %s4508_s11 = scalar_lea.hbm %s4564_s3, %s2648_s9  ;;  %p3143_p11 = scmp.ne.s32.totalorder %s4510_s27, %s3142_s7 }
 0x432   : > { %s3259_s8 = smov [#allocation8]  }
 0x433   : > { %p3144_p1 = pnand %p3143_p11, %p4584_p7  ;;  %s3146_s5 = sshll.u32 %s3259_s8, 4  ;;  %s3147_s5 = int_to_ptr.vmem [resolvable:$false] %s3146_s5 }
 0x434   : > { %s3148_s24 = scalar_lea.vmem %s3147_s5, 768  ;;  %p3149_p2 = scmp.lt.s32.totalorder %s4510_s27, %s3147_s5 }
 0x435   : > { %p3145_p5 = pneg %p3144_p1  ;;  %p3150_p4 = scmp.lt.s32.totalorder %s3148_s24, %s3142_s7 }
 0x437   : > { %p3151_p6 = por %p3150_p4, %p3149_p2 }
 0x439   : > { %p3152_p8 = pnand %p3151_p6, %p3145_p5 }
 0x4ee   : > { %v2348_v53 = vpop.f32.mrb[0].mxu1 }
 0x4ef   : > { %2358 = vst [vmem:[%s3527_s21 + $0x8] sm:$0xff] %v2348_v53  ;;  %v2350_v29 = vpop.f32.mrb[1].mxu1 }
 0x4f2   : > { %v2353_v43 = vpop.f32.mrb[2].mxu1 }
 0x4f3   : > { %v2343_v38 = vpop.f32.mrb[0].mxu0  ;;  %2359 = vst [vmem:[%s3527_s21 + $0x10] sm:$0xff] %v2353_v43  ;;  %v2355_v40 = vpop.f32.mrb[3].mxu1 }
 0x4f4   : > { %2357 = vst [vmem:[%s3527_s21] sm:$0xff] %v2343_v38  ;;  %v2345_v15 = vpop.f32.mrb[1].mxu0 }
 0x4f5   : > { %3155 = shalt.err (!%p3152_p8)
}
 0x4f6   : > { %s3156_s21 = scalar_lea.hbm %s4508_s11, 384  ;;  %s3160_s25 = scalar_lea.hbm %s4564_s3, 768 }
 0x4f7   : > { %p3157_p0 = scmp.ne.s32.totalorder %s4508_s11, %s3156_s21  ;;  %p3161_p13 = scmp.lt.u32.totalorder %s4508_s11, %s4564_s3 }
 0x4f8   : > { %p3162_p10 = scmp.lt.u32.totalorder %s3160_s25, %s3156_s21  ;;  %p3164_p11 = scmp.lt.u32.totalorder %s3156_s21, %s4508_s11 }
 0x4f9   : > { %p3158_p3 = pnand %p3157_p0, %p4584_p7 }
 0x4fa   : > { %p3163_p9 = por %p3162_p10, %p3161_p13 }
 0x4fb   : > { %p3159_p12 = pneg %p3158_p3 }
 0x4fc   : > { %p3165_p1 = por %p3164_p11, %p3163_p9 }
 0x4fe   : > { %p3166_p5 = pnand %p3165_p1, %p3159_p12 }
 0x500   : > { %3169 = shalt.err (!%p3166_p5)
}
 0x501   : > { %s3260_s9 = smov 128   ;;  %s3261_s12 = smov 8  }
 0x502   : > { %2654 = dma.vmem_to_hbm [thread:$0]  (%p4584_p7), %s4510_s27, 384, %s4508_s11, %s2361_s18, %s3260_s9, %s3260_s9, %s3261_s12  }
 0x503 PF: > { %s2415_s10 = sand.u32 1, %s3220_s15   ;;  %p4585_p2 = scmp.ne.s32.totalorder %s4575_s30, 0 }
 0x504   : > { %p4586_p4 = scmp.ge.s32.totalorder %s3240_s20, 2  ;;  %s2416_s7 = scalar_lea.sflag [#allocation5], %s2415_s10 }
 0x506   : > { %p2666_p6 = pnand %p4586_p4, %p4585_p2 }
 0x508   : > { %3211 = dma.done.wait (!%p2666_p6), %s2416_s7, 384  }
 0x509   : > { %3213 = vsyncadd (!%p2666_p6), %s2416_s7, 4294966912  ;;  %s2425_s8 = scalar_lea.sflag [#allocation10], %s2415_s10 }
 0x50a   : > { %3215 = dma.done.wait (!%p2666_p6), %s2425_s8, 768  }
 0x50b   : > { %3217 = vsyncadd (!%p2666_p6), %s2425_s8, 4294966528  ;;  %s27_s20 = sadd.s32 1, %s3240_s20   ;;  %s4587_s15 = smov %s3224_s16 }
 0x50c   : > { %p24_p8 = scmp.ge.s32.totalorder %s27_s20, 4   ;;  %s4588_s16 = smov %s3228_s17 }
 0x50d   : > { %s4589_s17 = smov %s3343_s29  ;;  %s4590_s18 = smov %s3236_s19 }
 0x50e   : > { %s4591_s19 = smov %s4593_s23  ;;  %26 = sbr.rel (!%p24_p8) target bundleno = 10 (0xa), region = 150 }
 0x515   :  { %2430 = vsyncpa [#allocation4], 1 }
 0x516   :  { %2432 = vsyncpa [#allocation4 + $0x1], 1 }
 0x517   :  { %2433 = vsyncpa [#allocation7], 1 }
 0x518   :  { %2435 = vsyncpa [#allocation7 + $0x1], 1 }
 0x519   :  { %2436 = vsyncpa [#allocation5], 1 }
 0x51a   :  { %2438 = vsyncpa [#allocation5 + $0x1], 1 }
 0x51b   :  { %2439 = vsyncpa [#allocation10], 1 }
 0x51c   :  { %2441 = vsyncpa [#allocation10 + $0x1], 1 }

</bundles_post_ra>
